<compile_context>
chip_gen: v5e
topology: v5e:2x2
jax: 0.10.0
libtpu: 0.0.40
codegen_flags: <defaults>
</compile_context>

<pallas_src>
import functools

import jax
import jax.numpy as jnp
import numpy as np
from jax import lax
from jax.experimental import pallas as pl
from jax.experimental.pallas import tpu as pltpu

HID = 100   # embedding / LSTM hidden size from the module
HP = 128    # lane-padded hidden size used inside the kernel


def _round_up(x, m):
    return -(-x // m) * m


# --------------------------------- kernel -----------------------------------

def _lstm_mlp_kernel(x_ref, lens_ref, wih_ref, whh_ref, bg_ref,
                     weff_ref, beff_ref, out_ref, gx_ref, *, T, B2):
    """x_ref: (T*B2, HP) bf16 time-major stacked-branch embeddings.

    lens_ref: (B2, HP) f32 per-row valid length, lane-broadcast.
    wih_ref/whh_ref: (HP, 4*HP) bf16, gate column order [i | f | o | g].
    bg_ref: (1, 4*HP) f32 gate bias (padded lanes exactly 0 -> padded gates
            stay at sigmoid(0)=0.5 times a cell/g of exactly 0).
    weff_ref: (HP, LP) bf16 collapsed fc1@fc2@fc3; beff_ref: (1, LP) = 2*b_eff.
    out_ref: (B2//2, LP) f32 logits (branch-a + branch-b); gx_ref: VMEM scratch.
    """
    hp = whh_ref.shape[0]

    # Hoisted input projection for every timestep of both branches: one bf16
    # MXU matmul, f32 accumulate, result parked in VMEM scratch (not vregs).
    gx_ref[...] = (jnp.dot(x_ref[...], wih_ref[...],
                           preferred_element_type=jnp.float32) + bg_ref[...])

    whh = whh_ref[...]                       # bf16 (HP, 4HP), loaded once
    lens = lens_ref[...]                     # f32  (B2, HP)

    h = jnp.zeros((B2, hp), jnp.float32)
    c = jnp.zeros((B2, hp), jnp.float32)
    hsum = jnp.zeros((B2, hp), jnp.float32)

    for t in range(T):                       # static -> fully unrolled
        r0 = t * B2                          # static, sublane-aligned
        gates = (gx_ref[pl.ds(r0, B2), :]
                 + jnp.dot(h.astype(jnp.bfloat16), whh,
                           preferred_element_type=jnp.float32))
        # gate order [i | f | o | g]: one EUP tanh over 3x128 lanes implements
        # the three sigmoids (sig(x) = 0.5*tanh(0.5*x) + 0.5), one tanh for g.
        sfo = 0.5 * jnp.tanh(0.5 * gates[:, :3 * hp]) + 0.5
        i_g = sfo[:, 0 * hp:1 * hp]
        f_g = sfo[:, 1 * hp:2 * hp]
        o_g = sfo[:, 2 * hp:3 * hp]
        g_g = jnp.tanh(gates[:, 3 * hp:])
        c = f_g * c + i_g * g_g
        h = o_g * jnp.tanh(c)
        # packed-sequence semantics: only valid steps (t < len) contribute.
        # (state needs no masking: padding is trailing, so post-sequence state
        #  never reaches a valid step; batch-padded rows are sliced off.)
        hsum = hsum + jnp.where(lens > t, h, 0.0)

    half = B2 // 2
    hs = hsum[:half] + hsum[half:]           # branch a + branch b
    # collapsed affine MLP (dropout = identity in eval mode, ReLU unused)
    out_ref[...] = (jnp.dot(hs.astype(jnp.bfloat16), weff_ref[...],
                            preferred_element_type=jnp.float32)
                    + beff_ref[...])


# -------------------------- one-time parameter prep --------------------------

def prepare_params(params):
    """Gate reorder/pad, affine collapse, bf16 cast, embedding pad. Run once."""
    G = 4 * HP
    L = params["w3"].shape[1]
    LP = max(128, _round_up(L, 128))
    vocab = params["embed"].shape[0]

    def reorder_pad_w(w):                    # (HID, 4*HID) -> (HP, 4*HP)
        w = np.asarray(w, np.float32)
        wi, wf, wg, wo = (w[:, k * HID:(k + 1) * HID] for k in range(4))
        out = np.zeros((HP, G), np.float32)
        for k, blk in enumerate((wi, wf, wo, wg)):     # -> [i | f | o | g]
            out[:HID, k * HP:k * HP + HID] = blk
        return out

    def reorder_pad_b(bv):                   # (1, 4*HID) -> (1, 4*HP)
        bv = np.asarray(bv, np.float32)
        bi, bf, bg_, bo = (bv[:, k * HID:(k + 1) * HID] for k in range(4))
        out = np.zeros((1, G), np.float32)   # padded lanes MUST stay 0
        for k, blk in enumerate((bi, bf, bo, bg_)):
            out[:, k * HP:k * HP + HID] = blk
        return out

    emb = np.zeros((vocab, HP), np.float32)
    emb[:, :HID] = np.asarray(params["embed"], np.float32)

    w1, w2, w3 = (np.asarray(params[k], np.float32) for k in ("w1", "w2", "w3"))
    b1, b2, b3 = (np.asarray(params[k], np.float32) for k in ("b1", "b2", "b3"))
    w_eff = w1 @ w2 @ w3                                   # (HID, L)
    b_eff = b1 @ w2 @ w3 + b2 @ w3 + b3                    # (1, L)
    weff = np.zeros((HP, LP), np.float32)
    weff[:HID, :L] = w_eff
    beff = np.zeros((1, LP), np.float32)
    beff[:, :L] = 2.0 * b_eff                              # a-branch + b-branch

    return {
        "emb":  jnp.asarray(emb, jnp.bfloat16),
        "wih":  jnp.asarray(reorder_pad_w(params["wih"]), jnp.bfloat16),
        "whh":  jnp.asarray(reorder_pad_w(params["whh"]), jnp.bfloat16),
        "bg":   jnp.asarray(reorder_pad_b(params["bg"]), jnp.float32),
        "weff": jnp.asarray(weff, jnp.bfloat16),
        "beff": jnp.asarray(beff, jnp.float32),
        "L": L, "LP": LP,
    }


# ------------------------------ forward wrapper ------------------------------

def net_forward_pallas(a_ids, b_ids, lengths_a, lengths_b, prep):
    B, T = a_ids.shape
    L, LP = prep["L"], prep["LP"]
    BP = max(8, _round_up(B, 8))             # per-branch padded batch
    B2 = 2 * BP                              # stacked (a, b) batch

    # stacked token ids, time-major; padded rows use id 0 (harmless: their
    # rows never contribute to the returned logits). One gather total.
    ids = jnp.zeros((T, B2), jnp.int32)
    ids = ids.at[:, :B].set(a_ids.T.astype(jnp.int32))
    ids = ids.at[:, BP:BP + B].set(b_ids.T.astype(jnp.int32))
    x2d = prep["emb"][ids.reshape(T * B2)]                  # (T*B2, HP) bf16

    # per-row valid lengths, lane-broadcast (mask computed in-kernel per step)
    lens = jnp.zeros((B2,), jnp.float32)
    lens = lens.at[:B].set(lengths_a.astype(jnp.float32))
    lens = lens.at[BP:BP + B].set(lengths_b.astype(jnp.float32))
    lens2d = jnp.broadcast_to(lens[:, None], (B2, HP))

    ins = (x2d, lens2d, prep["wih"], prep["whh"], prep["bg"],
           prep["weff"], prep["beff"])

    kernel = functools.partial(_lstm_mlp_kernel, T=T, B2=B2)
    out = pl.pallas_call(
        kernel,
        out_shape=jax.ShapeDtypeStruct((BP, LP), jnp.float32),
        grid=(1,),
        in_specs=[pl.BlockSpec(v.shape, lambda i, n=v.ndim: (0,) * n)
                  for v in ins],
        out_specs=pl.BlockSpec((BP, LP), lambda i: (0, 0)),
        scratch_shapes=[pltpu.VMEM((T * B2, 4 * HP), jnp.float32)],
        compiler_params=pltpu.CompilerParams(
            dimension_semantics=("arbitrary",)),
    )(*ins)
    return out[:B, :L]


# ---------------------- pure-JAX reference (for checking) --------------------

def _lstm_sum_ref(emb_bth, lengths, wih, whh, bg):
    B, T, H = emb_bth.shape
    mask = (jnp.arange(T)[None, :] < lengths[:, None]).astype(jnp.float32)

    def step(carry, xs):
        h, c, hsum = carry
        x_t, m_t = xs
        m = m_t[:, None]
        gates = x_t @ wih + h @ whh + bg
        i_g = jax.nn.sigmoid(gates[:, 0 * HID:1 * HID])
        f_g = jax.nn.sigmoid(gates[:, 1 * HID:2 * HID])
        g_g = jnp.tanh(gates[:, 2 * HID:3 * HID])
        o_g = jax.nn.sigmoid(gates[:, 3 * HID:4 * HID])
        c_new = f_g * c + i_g * g_g
        h_new = o_g * jnp.tanh(c_new)
        h = m * h_new + (1.0 - m) * h
        c = m * c_new + (1.0 - m) * c
        hsum = hsum + m * h_new
        return (h, c, hsum), None

    zeros = jnp.zeros((B, HID), jnp.float32)
    (h, c, hsum), _ = lax.scan(
        step, (zeros, zeros, zeros),
        (jnp.transpose(emb_bth, (1, 0, 2)), mask.T))
    return hsum


def net_forward_ref(a_ids, b_ids, lengths_a, lengths_b, p):
    emb = p["embed"]
    a_emb = emb[a_ids].astype(jnp.float32)
    b_emb = emb[b_ids].astype(jnp.float32)

    def branch(e, lens):
        hs = _lstm_sum_ref(e, lens, p["wih"], p["whh"], p["bg"])
        y = hs @ p["w1"] + p["b1"]
        y = y @ p["w2"] + p["b2"]
        y = y @ p["w3"] + p["b3"]
        return y

    return branch(a_emb, lengths_a) + branch(b_emb, lengths_b)


# --------------------------------- main --------------------------------------

def _init_params(key, vocab, label_size):
    ks = jax.random.split(key, 10)
    s = 0.05
    return {
        "embed": jax.random.normal(ks[0], (vocab, HID), jnp.float32) * s,
        "wih":   jax.random.normal(ks[1], (HID, 4 * HID), jnp.float32) * s,
        "whh":   jax.random.normal(ks[2], (HID, 4 * HID), jnp.float32) * s,
        "bg":    jax.random.normal(ks[3], (1, 4 * HID), jnp.float32) * s,
        "w1":    jax.random.normal(ks[4], (HID, 256), jnp.float32) * s,
        "b1":    jax.random.normal(ks[5], (1, 256), jnp.float32) * s,
        "w2":    jax.random.normal(ks[6], (256, 512), jnp.float32) * s,
        "b2":    jax.random.normal(ks[7], (1, 512), jnp.float32) * s,
        "w3":    jax.random.normal(ks[8], (512, label_size), jnp.float32) * s,
        "b3":    jax.random.normal(ks[9], (1, label_size), jnp.float32) * s,
    }


if __name__ == "__main__":
    key = jax.random.PRNGKey(0)
    vocab, label_size = 50, 8
    B, T = 2, 8

    params = _init_params(key, vocab, label_size)
    prep = prepare_params(params)            # one-time: reorder/pad/collapse

    ka, kb = jax.random.split(jax.random.PRNGKey(1))
    a_ids = jax.random.randint(ka, (B, T), 0, vocab, dtype=jnp.int32)
    b_ids = jax.random.randint(kb, (B, T), 0, vocab, dtype=jnp.int32)
    lengths_a = jnp.array([8, 5], dtype=jnp.int32)
    lengths_b = jnp.array([6, 8], dtype=jnp.int32)

    fwd = jax.jit(lambda a, b, la, lb: net_forward_pallas(a, b, la, lb, prep))
    out = jax.block_until_ready(fwd(a_ids, b_ids, lengths_a, lengths_b))

    ref = jax.block_until_ready(
        net_forward_ref(a_ids, b_ids, lengths_a, lengths_b, params))

    np.testing.assert_allclose(np.asarray(out), np.asarray(ref),
                               rtol=1e-2, atol=1e-2)
    # TODO(synk): dropout is identity (eval mode); training-mode stochastic
    # dropout is not reproduced in-kernel.
    print("KERNEL_OK")
</pallas_src>

<mosaic_0001>
module attributes {stable_mosaic.version = 11 : i64} {
  func.func @_lstm_mlp_kernel(%arg0: i32, %arg1: memref<128x128xbf16, #tpu.memory_space<vmem>>, %arg2: memref<16x128xf32, #tpu.memory_space<vmem>>, %arg3: memref<128x512xbf16, #tpu.memory_space<vmem>>, %arg4: memref<128x512xbf16, #tpu.memory_space<vmem>>, %arg5: memref<1x512xf32, #tpu.memory_space<vmem>>, %arg6: memref<128x128xbf16, #tpu.memory_space<vmem>>, %arg7: memref<1x128xf32, #tpu.memory_space<vmem>>, %arg8: memref<8x128xf32, #tpu.memory_space<vmem>>, %arg9: memref<128x512xf32, #tpu.memory_space<vmem>>) attributes {dimension_semantics = [#tpu.dimension_semantics<arbitrary>], iteration_bounds = array<i64: 1>, scalar_prefetch = 0 : i64, scratch_operands = 1 : i64, tpu.core_type = #tpu.core_type<tc>, window_params = [{pipeline_mode = #tpu.pipeline_mode<synchronous>, transform_indices = @transform_0, window_bounds = array<i64: 128, 128>}, {pipeline_mode = #tpu.pipeline_mode<synchronous>, transform_indices = @transform_1, window_bounds = array<i64: 16, 128>}, {pipeline_mode = #tpu.pipeline_mode<synchronous>, transform_indices = @transform_2, window_bounds = array<i64: 128, 512>}, {pipeline_mode = #tpu.pipeline_mode<synchronous>, transform_indices = @transform_3, window_bounds = array<i64: 128, 512>}, {pipeline_mode = #tpu.pipeline_mode<synchronous>, transform_indices = @transform_4, window_bounds = array<i64: 1, 512>}, {pipeline_mode = #tpu.pipeline_mode<synchronous>, transform_indices = @transform_5, window_bounds = array<i64: 128, 128>}, {pipeline_mode = #tpu.pipeline_mode<synchronous>, transform_indices = @transform_6, window_bounds = array<i64: 1, 128>}, {pipeline_mode = #tpu.pipeline_mode<synchronous>, transform_indices = @transform_7, window_bounds = array<i64: 8, 128>}]} {
    %c0 = arith.constant 0 : index
    %c0_0 = arith.constant 0 : index
    %0 = vector.load %arg1[%c0, %c0_0] : memref<128x128xbf16, #tpu.memory_space<vmem>>, vector<128x128xbf16>
    %c0_1 = arith.constant 0 : index
    %c0_2 = arith.constant 0 : index
    %1 = vector.load %arg3[%c0_1, %c0_2] : memref<128x512xbf16, #tpu.memory_space<vmem>>, vector<128x512xbf16>
    %cst = arith.constant dense<0.000000e+00> : vector<128x512xf32>
    %2 = tpu.matmul %0, %1, %cst {dimension_numbers = #tpu.dot_dimension_numbers<[1], [0], [0], [1], [0, 0, 1, 1], [], []>} : vector<128x128xbf16>, vector<128x512xbf16>, vector<128x512xf32> -> vector<128x512xf32>
    %c0_3 = arith.constant 0 : index
    %c0_4 = arith.constant 0 : index
    %3 = vector.load %arg5[%c0_3, %c0_4] : memref<1x512xf32, #tpu.memory_space<vmem>>, vector<1x512xf32>
    %4 = vector.broadcast %3 : vector<1x512xf32> to vector<128x512xf32>
    %5 = arith.addf %2, %4 : vector<128x512xf32>
    %c0_5 = arith.constant 0 : index
    %c0_6 = arith.constant 0 : index
    %6 = vector.load %arg9[%c0_5, %c0_6] : memref<128x512xf32, #tpu.memory_space<vmem>>, vector<128x512xf32>
    tpu.vector_store %arg9[%c0_5, %c0_6], %5 {strides = array<i32>} : memref<128x512xf32, #tpu.memory_space<vmem>>, vector<128x512xf32>,
    %c0_7 = arith.constant 0 : index
    %c0_8 = arith.constant 0 : index
    %7 = vector.load %arg4[%c0_7, %c0_8] : memref<128x512xbf16, #tpu.memory_space<vmem>>, vector<128x512xbf16>
    %c0_9 = arith.constant 0 : index
    %c0_10 = arith.constant 0 : index
    %8 = vector.load %arg2[%c0_9, %c0_10] : memref<16x128xf32, #tpu.memory_space<vmem>>, vector<16x128xf32>
    %cst_11 = arith.constant 0.000000e+00 : f32
    %9 = vector.broadcast %cst_11 : f32 to vector<16x128xf32>
    %cst_12 = arith.constant 0.000000e+00 : f32
    %10 = vector.broadcast %cst_12 : f32 to vector<16x128xf32>
    %cst_13 = arith.constant 0.000000e+00 : f32
    %11 = vector.broadcast %cst_13 : f32 to vector<16x128xf32>
    %c0_14 = arith.constant 0 : index
    %c0_15 = arith.constant 0 : index
    %12 = vector.load %arg9[%c0_14, %c0_15] : memref<128x512xf32, #tpu.memory_space<vmem>>, vector<16x512xf32>
    %13 = arith.truncf %9 : vector<16x128xf32> to vector<16x128xbf16>
    %cst_16 = arith.constant dense<0.000000e+00> : vector<16x512xf32>
    %14 = tpu.matmul %13, %7, %cst_16 {dimension_numbers = #tpu.dot_dimension_numbers<[1], [0], [0], [1], [0, 0, 1, 1], [], []>} : vector<16x128xbf16>, vector<128x512xbf16>, vector<16x512xf32> -> vector<16x512xf32>
    %15 = arith.addf %12, %14 : vector<16x512xf32>
    %16 = vector.extract_strided_slice %15 {offsets = [0, 0], sizes = [16, 384], strides = [1, 1]} : vector<16x512xf32> to vector<16x384xf32>
    %cst_17 = arith.constant 5.000000e-01 : f32
    %17 = vector.broadcast %cst_17 : f32 to vector<16x384xf32>
    %18 = arith.mulf %17, %16 : vector<16x384xf32>
    %19 = math.tanh %18 : vector<16x384xf32>
    %cst_18 = arith.constant 5.000000e-01 : f32
    %20 = vector.broadcast %cst_18 : f32 to vector<16x384xf32>
    %21 = arith.mulf %20, %19 : vector<16x384xf32>
    %cst_19 = arith.constant 5.000000e-01 : f32
    %22 = vector.broadcast %cst_19 : f32 to vector<16x384xf32>
    %23 = arith.addf %21, %22 : vector<16x384xf32>
    %24 = vector.extract_strided_slice %23 {offsets = [0, 0], sizes = [16, 128], strides = [1, 1]} : vector<16x384xf32> to vector<16x128xf32>
    %25 = vector.extract_strided_slice %23 {offsets = [0, 128], sizes = [16, 128], strides = [1, 1]} : vector<16x384xf32> to vector<16x128xf32>
    %26 = vector.extract_strided_slice %23 {offsets = [0, 256], sizes = [16, 128], strides = [1, 1]} : vector<16x384xf32> to vector<16x128xf32>
    %27 = vector.extract_strided_slice %15 {offsets = [0, 384], sizes = [16, 128], strides = [1, 1]} : vector<16x512xf32> to vector<16x128xf32>
    %28 = math.tanh %27 : vector<16x128xf32>
    %29 = arith.mulf %25, %10 : vector<16x128xf32>
    %30 = arith.mulf %24, %28 : vector<16x128xf32>
    %31 = arith.addf %29, %30 : vector<16x128xf32>
    %32 = math.tanh %31 : vector<16x128xf32>
    %33 = arith.mulf %26, %32 : vector<16x128xf32>
    %cst_20 = arith.constant 0.000000e+00 : f32
    %34 = vector.broadcast %cst_20 : f32 to vector<16x128xf32>
    %35 = arith.cmpf ogt, %8, %34 : vector<16x128xf32>
    %cst_21 = arith.constant 0.000000e+00 : f32
    %36 = vector.broadcast %cst_21 : f32 to vector<16x128xf32>
    %37 = arith.select %35, %33, %36 : vector<16x128xi1>, vector<16x128xf32>
    %38 = arith.addf %11, %37 : vector<16x128xf32>
    %c16 = arith.constant 16 : index
    %c0_22 = arith.constant 0 : index
    %39 = vector.load %arg9[%c16, %c0_22] : memref<128x512xf32, #tpu.memory_space<vmem>>, vector<16x512xf32>
    %40 = arith.truncf %33 : vector<16x128xf32> to vector<16x128xbf16>
    %cst_23 = arith.constant dense<0.000000e+00> : vector<16x512xf32>
    %41 = tpu.matmul %40, %7, %cst_23 {dimension_numbers = #tpu.dot_dimension_numbers<[1], [0], [0], [1], [0, 0, 1, 1], [], []>} : vector<16x128xbf16>, vector<128x512xbf16>, vector<16x512xf32> -> vector<16x512xf32>
    %42 = arith.addf %39, %41 : vector<16x512xf32>
    %43 = vector.extract_strided_slice %42 {offsets = [0, 0], sizes = [16, 384], strides = [1, 1]} : vector<16x512xf32> to vector<16x384xf32>
    %cst_24 = arith.constant 5.000000e-01 : f32
    %44 = vector.broadcast %cst_24 : f32 to vector<16x384xf32>
    %45 = arith.mulf %44, %43 : vector<16x384xf32>
    %46 = math.tanh %45 : vector<16x384xf32>
    %cst_25 = arith.constant 5.000000e-01 : f32
    %47 = vector.broadcast %cst_25 : f32 to vector<16x384xf32>
    %48 = arith.mulf %47, %46 : vector<16x384xf32>
    %cst_26 = arith.constant 5.000000e-01 : f32
    %49 = vector.broadcast %cst_26 : f32 to vector<16x384xf32>
    %50 = arith.addf %48, %49 : vector<16x384xf32>
    %51 = vector.extract_strided_slice %50 {offsets = [0, 0], sizes = [16, 128], strides = [1, 1]} : vector<16x384xf32> to vector<16x128xf32>
    %52 = vector.extract_strided_slice %50 {offsets = [0, 128], sizes = [16, 128], strides = [1, 1]} : vector<16x384xf32> to vector<16x128xf32>
    %53 = vector.extract_strided_slice %50 {offsets = [0, 256], sizes = [16, 128], strides = [1, 1]} : vector<16x384xf32> to vector<16x128xf32>
    %54 = vector.extract_strided_slice %42 {offsets = [0, 384], sizes = [16, 128], strides = [1, 1]} : vector<16x512xf32> to vector<16x128xf32>
    %55 = math.tanh %54 : vector<16x128xf32>
    %56 = arith.mulf %52, %31 : vector<16x128xf32>
    %57 = arith.mulf %51, %55 : vector<16x128xf32>
    %58 = arith.addf %56, %57 : vector<16x128xf32>
    %59 = math.tanh %58 : vector<16x128xf32>
    %60 = arith.mulf %53, %59 : vector<16x128xf32>
    %cst_27 = arith.constant 1.000000e+00 : f32
    %61 = vector.broadcast %cst_27 : f32 to vector<16x128xf32>
    %62 = arith.cmpf ogt, %8, %61 : vector<16x128xf32>
    %cst_28 = arith.constant 0.000000e+00 : f32
    %63 = vector.broadcast %cst_28 : f32 to vector<16x128xf32>
    %64 = arith.select %62, %60, %63 : vector<16x128xi1>, vector<16x128xf32>
    %65 = arith.addf %38, %64 : vector<16x128xf32>
    %c32 = arith.constant 32 : index
    %c0_29 = arith.constant 0 : index
    %66 = vector.load %arg9[%c32, %c0_29] : memref<128x512xf32, #tpu.memory_space<vmem>>, vector<16x512xf32>
    %67 = arith.truncf %60 : vector<16x128xf32> to vector<16x128xbf16>
    %cst_30 = arith.constant dense<0.000000e+00> : vector<16x512xf32>
    %68 = tpu.matmul %67, %7, %cst_30 {dimension_numbers = #tpu.dot_dimension_numbers<[1], [0], [0], [1], [0, 0, 1, 1], [], []>} : vector<16x128xbf16>, vector<128x512xbf16>, vector<16x512xf32> -> vector<16x512xf32>
    %69 = arith.addf %66, %68 : vector<16x512xf32>
    %70 = vector.extract_strided_slice %69 {offsets = [0, 0], sizes = [16, 384], strides = [1, 1]} : vector<16x512xf32> to vector<16x384xf32>
    %cst_31 = arith.constant 5.000000e-01 : f32
    %71 = vector.broadcast %cst_31 : f32 to vector<16x384xf32>
    %72 = arith.mulf %71, %70 : vector<16x384xf32>
    %73 = math.tanh %72 : vector<16x384xf32>
    %cst_32 = arith.constant 5.000000e-01 : f32
    %74 = vector.broadcast %cst_32 : f32 to vector<16x384xf32>
    %75 = arith.mulf %74, %73 : vector<16x384xf32>
    %cst_33 = arith.constant 5.000000e-01 : f32
    %76 = vector.broadcast %cst_33 : f32 to vector<16x384xf32>
    %77 = arith.addf %75, %76 : vector<16x384xf32>
    %78 = vector.extract_strided_slice %77 {offsets = [0, 0], sizes = [16, 128], strides = [1, 1]} : vector<16x384xf32> to vector<16x128xf32>
    %79 = vector.extract_strided_slice %77 {offsets = [0, 128], sizes = [16, 128], strides = [1, 1]} : vector<16x384xf32> to vector<16x128xf32>
    %80 = vector.extract_strided_slice %77 {offsets = [0, 256], sizes = [16, 128], strides = [1, 1]} : vector<16x384xf32> to vector<16x128xf32>
    %81 = vector.extract_strided_slice %69 {offsets = [0, 384], sizes = [16, 128], strides = [1, 1]} : vector<16x512xf32> to vector<16x128xf32>
    %82 = math.tanh %81 : vector<16x128xf32>
    %83 = arith.mulf %79, %58 : vector<16x128xf32>
    %84 = arith.mulf %78, %82 : vector<16x128xf32>
    %85 = arith.addf %83, %84 : vector<16x128xf32>
    %86 = math.tanh %85 : vector<16x128xf32>
    %87 = arith.mulf %80, %86 : vector<16x128xf32>
    %cst_34 = arith.constant 2.000000e+00 : f32
    %88 = vector.broadcast %cst_34 : f32 to vector<16x128xf32>
    %89 = arith.cmpf ogt, %8, %88 : vector<16x128xf32>
    %cst_35 = arith.constant 0.000000e+00 : f32
    %90 = vector.broadcast %cst_35 : f32 to vector<16x128xf32>
    %91 = arith.select %89, %87, %90 : vector<16x128xi1>, vector<16x128xf32>
    %92 = arith.addf %65, %91 : vector<16x128xf32>
    %c48 = arith.constant 48 : index
    %c0_36 = arith.constant 0 : index
    %93 = vector.load %arg9[%c48, %c0_36] : memref<128x512xf32, #tpu.memory_space<vmem>>, vector<16x512xf32>
    %94 = arith.truncf %87 : vector<16x128xf32> to vector<16x128xbf16>
    %cst_37 = arith.constant dense<0.000000e+00> : vector<16x512xf32>
    %95 = tpu.matmul %94, %7, %cst_37 {dimension_numbers = #tpu.dot_dimension_numbers<[1], [0], [0], [1], [0, 0, 1, 1], [], []>} : vector<16x128xbf16>, vector<128x512xbf16>, vector<16x512xf32> -> vector<16x512xf32>
    %96 = arith.addf %93, %95 : vector<16x512xf32>
    %97 = vector.extract_strided_slice %96 {offsets = [0, 0], sizes = [16, 384], strides = [1, 1]} : vector<16x512xf32> to vector<16x384xf32>
    %cst_38 = arith.constant 5.000000e-01 : f32
    %98 = vector.broadcast %cst_38 : f32 to vector<16x384xf32>
    %99 = arith.mulf %98, %97 : vector<16x384xf32>
    %100 = math.tanh %99 : vector<16x384xf32>
    %cst_39 = arith.constant 5.000000e-01 : f32
    %101 = vector.broadcast %cst_39 : f32 to vector<16x384xf32>
    %102 = arith.mulf %101, %100 : vector<16x384xf32>
    %cst_40 = arith.constant 5.000000e-01 : f32
    %103 = vector.broadcast %cst_40 : f32 to vector<16x384xf32>
    %104 = arith.addf %102, %103 : vector<16x384xf32>
    %105 = vector.extract_strided_slice %104 {offsets = [0, 0], sizes = [16, 128], strides = [1, 1]} : vector<16x384xf32> to vector<16x128xf32>
    %106 = vector.extract_strided_slice %104 {offsets = [0, 128], sizes = [16, 128], strides = [1, 1]} : vector<16x384xf32> to vector<16x128xf32>
    %107 = vector.extract_strided_slice %104 {offsets = [0, 256], sizes = [16, 128], strides = [1, 1]} : vector<16x384xf32> to vector<16x128xf32>
    %108 = vector.extract_strided_slice %96 {offsets = [0, 384], sizes = [16, 128], strides = [1, 1]} : vector<16x512xf32> to vector<16x128xf32>
    %109 = math.tanh %108 : vector<16x128xf32>
    %110 = arith.mulf %106, %85 : vector<16x128xf32>
    %111 = arith.mulf %105, %109 : vector<16x128xf32>
    %112 = arith.addf %110, %111 : vector<16x128xf32>
    %113 = math.tanh %112 : vector<16x128xf32>
    %114 = arith.mulf %107, %113 : vector<16x128xf32>
    %cst_41 = arith.constant 3.000000e+00 : f32
    %115 = vector.broadcast %cst_41 : f32 to vector<16x128xf32>
    %116 = arith.cmpf ogt, %8, %115 : vector<16x128xf32>
    %cst_42 = arith.constant 0.000000e+00 : f32
    %117 = vector.broadcast %cst_42 : f32 to vector<16x128xf32>
    %118 = arith.select %116, %114, %117 : vector<16x128xi1>, vector<16x128xf32>
    %119 = arith.addf %92, %118 : vector<16x128xf32>
    %c64 = arith.constant 64 : index
    %c0_43 = arith.constant 0 : index
    %120 = vector.load %arg9[%c64, %c0_43] : memref<128x512xf32, #tpu.memory_space<vmem>>, vector<16x512xf32>
    %121 = arith.truncf %114 : vector<16x128xf32> to vector<16x128xbf16>
    %cst_44 = arith.constant dense<0.000000e+00> : vector<16x512xf32>
    %122 = tpu.matmul %121, %7, %cst_44 {dimension_numbers = #tpu.dot_dimension_numbers<[1], [0], [0], [1], [0, 0, 1, 1], [], []>} : vector<16x128xbf16>, vector<128x512xbf16>, vector<16x512xf32> -> vector<16x512xf32>
    %123 = arith.addf %120, %122 : vector<16x512xf32>
    %124 = vector.extract_strided_slice %123 {offsets = [0, 0], sizes = [16, 384], strides = [1, 1]} : vector<16x512xf32> to vector<16x384xf32>
    %cst_45 = arith.constant 5.000000e-01 : f32
    %125 = vector.broadcast %cst_45 : f32 to vector<16x384xf32>
    %126 = arith.mulf %125, %124 : vector<16x384xf32>
    %127 = math.tanh %126 : vector<16x384xf32>
    %cst_46 = arith.constant 5.000000e-01 : f32
    %128 = vector.broadcast %cst_46 : f32 to vector<16x384xf32>
    %129 = arith.mulf %128, %127 : vector<16x384xf32>
    %cst_47 = arith.constant 5.000000e-01 : f32
    %130 = vector.broadcast %cst_47 : f32 to vector<16x384xf32>
    %131 = arith.addf %129, %130 : vector<16x384xf32>
    %132 = vector.extract_strided_slice %131 {offsets = [0, 0], sizes = [16, 128], strides = [1, 1]} : vector<16x384xf32> to vector<16x128xf32>
    %133 = vector.extract_strided_slice %131 {offsets = [0, 128], sizes = [16, 128], strides = [1, 1]} : vector<16x384xf32> to vector<16x128xf32>
    %134 = vector.extract_strided_slice %131 {offsets = [0, 256], sizes = [16, 128], strides = [1, 1]} : vector<16x384xf32> to vector<16x128xf32>
    %135 = vector.extract_strided_slice %123 {offsets = [0, 384], sizes = [16, 128], strides = [1, 1]} : vector<16x512xf32> to vector<16x128xf32>
    %136 = math.tanh %135 : vector<16x128xf32>
    %137 = arith.mulf %133, %112 : vector<16x128xf32>
    %138 = arith.mulf %132, %136 : vector<16x128xf32>
    %139 = arith.addf %137, %138 : vector<16x128xf32>
    %140 = math.tanh %139 : vector<16x128xf32>
    %141 = arith.mulf %134, %140 : vector<16x128xf32>
    %cst_48 = arith.constant 4.000000e+00 : f32
    %142 = vector.broadcast %cst_48 : f32 to vector<16x128xf32>
    %143 = arith.cmpf ogt, %8, %142 : vector<16x128xf32>
    %cst_49 = arith.constant 0.000000e+00 : f32
    %144 = vector.broadcast %cst_49 : f32 to vector<16x128xf32>
    %145 = arith.select %143, %141, %144 : vector<16x128xi1>, vector<16x128xf32>
    %146 = arith.addf %119, %145 : vector<16x128xf32>
    %c80 = arith.constant 80 : index
    %c0_50 = arith.constant 0 : index
    %147 = vector.load %arg9[%c80, %c0_50] : memref<128x512xf32, #tpu.memory_space<vmem>>, vector<16x512xf32>
    %148 = arith.truncf %141 : vector<16x128xf32> to vector<16x128xbf16>
    %cst_51 = arith.constant dense<0.000000e+00> : vector<16x512xf32>
    %149 = tpu.matmul %148, %7, %cst_51 {dimension_numbers = #tpu.dot_dimension_numbers<[1], [0], [0], [1], [0, 0, 1, 1], [], []>} : vector<16x128xbf16>, vector<128x512xbf16>, vector<16x512xf32> -> vector<16x512xf32>
    %150 = arith.addf %147, %149 : vector<16x512xf32>
    %151 = vector.extract_strided_slice %150 {offsets = [0, 0], sizes = [16, 384], strides = [1, 1]} : vector<16x512xf32> to vector<16x384xf32>
    %cst_52 = arith.constant 5.000000e-01 : f32
    %152 = vector.broadcast %cst_52 : f32 to vector<16x384xf32>
    %153 = arith.mulf %152, %151 : vector<16x384xf32>
    %154 = math.tanh %153 : vector<16x384xf32>
    %cst_53 = arith.constant 5.000000e-01 : f32
    %155 = vector.broadcast %cst_53 : f32 to vector<16x384xf32>
    %156 = arith.mulf %155, %154 : vector<16x384xf32>
    %cst_54 = arith.constant 5.000000e-01 : f32
    %157 = vector.broadcast %cst_54 : f32 to vector<16x384xf32>
    %158 = arith.addf %156, %157 : vector<16x384xf32>
    %159 = vector.extract_strided_slice %158 {offsets = [0, 0], sizes = [16, 128], strides = [1, 1]} : vector<16x384xf32> to vector<16x128xf32>
    %160 = vector.extract_strided_slice %158 {offsets = [0, 128], sizes = [16, 128], strides = [1, 1]} : vector<16x384xf32> to vector<16x128xf32>
    %161 = vector.extract_strided_slice %158 {offsets = [0, 256], sizes = [16, 128], strides = [1, 1]} : vector<16x384xf32> to vector<16x128xf32>
    %162 = vector.extract_strided_slice %150 {offsets = [0, 384], sizes = [16, 128], strides = [1, 1]} : vector<16x512xf32> to vector<16x128xf32>
    %163 = math.tanh %162 : vector<16x128xf32>
    %164 = arith.mulf %160, %139 : vector<16x128xf32>
    %165 = arith.mulf %159, %163 : vector<16x128xf32>
    %166 = arith.addf %164, %165 : vector<16x128xf32>
    %167 = math.tanh %166 : vector<16x128xf32>
    %168 = arith.mulf %161, %167 : vector<16x128xf32>
    %cst_55 = arith.constant 5.000000e+00 : f32
    %169 = vector.broadcast %cst_55 : f32 to vector<16x128xf32>
    %170 = arith.cmpf ogt, %8, %169 : vector<16x128xf32>
    %cst_56 = arith.constant 0.000000e+00 : f32
    %171 = vector.broadcast %cst_56 : f32 to vector<16x128xf32>
    %172 = arith.select %170, %168, %171 : vector<16x128xi1>, vector<16x128xf32>
    %173 = arith.addf %146, %172 : vector<16x128xf32>
    %c96 = arith.constant 96 : index
    %c0_57 = arith.constant 0 : index
    %174 = vector.load %arg9[%c96, %c0_57] : memref<128x512xf32, #tpu.memory_space<vmem>>, vector<16x512xf32>
    %175 = arith.truncf %168 : vector<16x128xf32> to vector<16x128xbf16>
    %cst_58 = arith.constant dense<0.000000e+00> : vector<16x512xf32>
    %176 = tpu.matmul %175, %7, %cst_58 {dimension_numbers = #tpu.dot_dimension_numbers<[1], [0], [0], [1], [0, 0, 1, 1], [], []>} : vector<16x128xbf16>, vector<128x512xbf16>, vector<16x512xf32> -> vector<16x512xf32>
    %177 = arith.addf %174, %176 : vector<16x512xf32>
    %178 = vector.extract_strided_slice %177 {offsets = [0, 0], sizes = [16, 384], strides = [1, 1]} : vector<16x512xf32> to vector<16x384xf32>
    %cst_59 = arith.constant 5.000000e-01 : f32
    %179 = vector.broadcast %cst_59 : f32 to vector<16x384xf32>
    %180 = arith.mulf %179, %178 : vector<16x384xf32>
    %181 = math.tanh %180 : vector<16x384xf32>
    %cst_60 = arith.constant 5.000000e-01 : f32
    %182 = vector.broadcast %cst_60 : f32 to vector<16x384xf32>
    %183 = arith.mulf %182, %181 : vector<16x384xf32>
    %cst_61 = arith.constant 5.000000e-01 : f32
    %184 = vector.broadcast %cst_61 : f32 to vector<16x384xf32>
    %185 = arith.addf %183, %184 : vector<16x384xf32>
    %186 = vector.extract_strided_slice %185 {offsets = [0, 0], sizes = [16, 128], strides = [1, 1]} : vector<16x384xf32> to vector<16x128xf32>
    %187 = vector.extract_strided_slice %185 {offsets = [0, 128], sizes = [16, 128], strides = [1, 1]} : vector<16x384xf32> to vector<16x128xf32>
    %188 = vector.extract_strided_slice %185 {offsets = [0, 256], sizes = [16, 128], strides = [1, 1]} : vector<16x384xf32> to vector<16x128xf32>
    %189 = vector.extract_strided_slice %177 {offsets = [0, 384], sizes = [16, 128], strides = [1, 1]} : vector<16x512xf32> to vector<16x128xf32>
    %190 = math.tanh %189 : vector<16x128xf32>
    %191 = arith.mulf %187, %166 : vector<16x128xf32>
    %192 = arith.mulf %186, %190 : vector<16x128xf32>
    %193 = arith.addf %191, %192 : vector<16x128xf32>
    %194 = math.tanh %193 : vector<16x128xf32>
    %195 = arith.mulf %188, %194 : vector<16x128xf32>
    %cst_62 = arith.constant 6.000000e+00 : f32
    %196 = vector.broadcast %cst_62 : f32 to vector<16x128xf32>
    %197 = arith.cmpf ogt, %8, %196 : vector<16x128xf32>
    %cst_63 = arith.constant 0.000000e+00 : f32
    %198 = vector.broadcast %cst_63 : f32 to vector<16x128xf32>
    %199 = arith.select %197, %195, %198 : vector<16x128xi1>, vector<16x128xf32>
    %200 = arith.addf %173, %199 : vector<16x128xf32>
    %c112 = arith.constant 112 : index
    %c0_64 = arith.constant 0 : index
    %201 = vector.load %arg9[%c112, %c0_64] : memref<128x512xf32, #tpu.memory_space<vmem>>, vector<16x512xf32>
    %202 = arith.truncf %195 : vector<16x128xf32> to vector<16x128xbf16>
    %cst_65 = arith.constant dense<0.000000e+00> : vector<16x512xf32>
    %203 = tpu.matmul %202, %7, %cst_65 {dimension_numbers = #tpu.dot_dimension_numbers<[1], [0], [0], [1], [0, 0, 1, 1], [], []>} : vector<16x128xbf16>, vector<128x512xbf16>, vector<16x512xf32> -> vector<16x512xf32>
    %204 = arith.addf %201, %203 : vector<16x512xf32>
    %205 = vector.extract_strided_slice %204 {offsets = [0, 0], sizes = [16, 384], strides = [1, 1]} : vector<16x512xf32> to vector<16x384xf32>
    %cst_66 = arith.constant 5.000000e-01 : f32
    %206 = vector.broadcast %cst_66 : f32 to vector<16x384xf32>
    %207 = arith.mulf %206, %205 : vector<16x384xf32>
    %208 = math.tanh %207 : vector<16x384xf32>
    %cst_67 = arith.constant 5.000000e-01 : f32
    %209 = vector.broadcast %cst_67 : f32 to vector<16x384xf32>
    %210 = arith.mulf %209, %208 : vector<16x384xf32>
    %cst_68 = arith.constant 5.000000e-01 : f32
    %211 = vector.broadcast %cst_68 : f32 to vector<16x384xf32>
    %212 = arith.addf %210, %211 : vector<16x384xf32>
    %213 = vector.extract_strided_slice %212 {offsets = [0, 0], sizes = [16, 128], strides = [1, 1]} : vector<16x384xf32> to vector<16x128xf32>
    %214 = vector.extract_strided_slice %212 {offsets = [0, 128], sizes = [16, 128], strides = [1, 1]} : vector<16x384xf32> to vector<16x128xf32>
    %215 = vector.extract_strided_slice %212 {offsets = [0, 256], sizes = [16, 128], strides = [1, 1]} : vector<16x384xf32> to vector<16x128xf32>
    %216 = vector.extract_strided_slice %204 {offsets = [0, 384], sizes = [16, 128], strides = [1, 1]} : vector<16x512xf32> to vector<16x128xf32>
    %217 = math.tanh %216 : vector<16x128xf32>
    %218 = arith.mulf %214, %193 : vector<16x128xf32>
    %219 = arith.mulf %213, %217 : vector<16x128xf32>
    %220 = arith.addf %218, %219 : vector<16x128xf32>
    %221 = math.tanh %220 : vector<16x128xf32>
    %222 = arith.mulf %215, %221 : vector<16x128xf32>
    %cst_69 = arith.constant 7.000000e+00 : f32
    %223 = vector.broadcast %cst_69 : f32 to vector<16x128xf32>
    %224 = arith.cmpf ogt, %8, %223 : vector<16x128xf32>
    %cst_70 = arith.constant 0.000000e+00 : f32
    %225 = vector.broadcast %cst_70 : f32 to vector<16x128xf32>
    %226 = arith.select %224, %222, %225 : vector<16x128xi1>, vector<16x128xf32>
    %227 = arith.addf %200, %226 : vector<16x128xf32>
    %228 = vector.extract_strided_slice %227 {offsets = [0, 0], sizes = [8, 128], strides = [1, 1]} : vector<16x128xf32> to vector<8x128xf32>
    %229 = vector.extract_strided_slice %227 {offsets = [8, 0], sizes = [8, 128], strides = [1, 1]} : vector<16x128xf32> to vector<8x128xf32>
    %230 = arith.addf %228, %229 : vector<8x128xf32>
    %231 = arith.truncf %230 : vector<8x128xf32> to vector<8x128xbf16>
    %c0_71 = arith.constant 0 : index
    %c0_72 = arith.constant 0 : index
    %232 = vector.load %arg6[%c0_71, %c0_72] : memref<128x128xbf16, #tpu.memory_space<vmem>>, vector<128x128xbf16>
    %cst_73 = arith.constant dense<0.000000e+00> : vector<8x128xf32>
    %233 = tpu.matmul %231, %232, %cst_73 {dimension_numbers = #tpu.dot_dimension_numbers<[1], [0], [0], [1], [0, 0, 1, 1], [], []>} : vector<8x128xbf16>, vector<128x128xbf16>, vector<8x128xf32> -> vector<8x128xf32>
    %c0_74 = arith.constant 0 : index
    %c0_75 = arith.constant 0 : index
    %234 = vector.load %arg7[%c0_74, %c0_75] : memref<1x128xf32, #tpu.memory_space<vmem>>, vector<1x128xf32>
    %235 = vector.broadcast %234 : vector<1x128xf32> to vector<8x128xf32>
    %236 = arith.addf %233, %235 : vector<8x128xf32>
    %c0_76 = arith.constant 0 : index
    %c0_77 = arith.constant 0 : index
    %237 = vector.load %arg8[%c0_76, %c0_77] : memref<8x128xf32, #tpu.memory_space<vmem>>, vector<8x128xf32>
    tpu.vector_store %arg8[%c0_76, %c0_77], %236 {strides = array<i32>} : memref<8x128xf32, #tpu.memory_space<vmem>>, vector<8x128xf32>,
    return
  }
  func.func @transform_0(%arg0: i32) -> (i32, i32) {
    %c0_i32 = arith.constant 0 : i32
    %c0_i32_0 = arith.constant 0 : i32
    %c0_i32_1 = arith.constant 0 : i32
    return %c0_i32, %c0_i32_0 : i32, i32
  }
  func.func @transform_1(%arg0: i32) -> (i32, i32) {
    %c0_i32 = arith.constant 0 : i32
    %c0_i32_0 = arith.constant 0 : i32
    %c0_i32_1 = arith.constant 0 : i32
    return %c0_i32, %c0_i32_0 : i32, i32
  }
  func.func @transform_2(%arg0: i32) -> (i32, i32) {
    %c0_i32 = arith.constant 0 : i32
    %c0_i32_0 = arith.constant 0 : i32
    %c0_i32_1 = arith.constant 0 : i32
    return %c0_i32, %c0_i32_0 : i32, i32
  }
  func.func @transform_3(%arg0: i32) -> (i32, i32) {
    %c0_i32 = arith.constant 0 : i32
    %c0_i32_0 = arith.constant 0 : i32
    %c0_i32_1 = arith.constant 0 : i32
    return %c0_i32, %c0_i32_0 : i32, i32
  }
  func.func @transform_4(%arg0: i32) -> (i32, i32) {
    %c0_i32 = arith.constant 0 : i32
    %c0_i32_0 = arith.constant 0 : i32
    %c0_i32_1 = arith.constant 0 : i32
    return %c0_i32, %c0_i32_0 : i32, i32
  }
  func.func @transform_5(%arg0: i32) -> (i32, i32) {
    %c0_i32 = arith.constant 0 : i32
    %c0_i32_0 = arith.constant 0 : i32
    %c0_i32_1 = arith.constant 0 : i32
    return %c0_i32, %c0_i32_0 : i32, i32
  }
  func.func @transform_6(%arg0: i32) -> (i32, i32) {
    %c0_i32 = arith.constant 0 : i32
    %c0_i32_0 = arith.constant 0 : i32
    %c0_i32_1 = arith.constant 0 : i32
    return %c0_i32, %c0_i32_0 : i32, i32
  }
  func.func @transform_7(%arg0: i32) -> (i32, i32) {
    %c0_i32 = arith.constant 0 : i32
    %c0_i32_0 = arith.constant 0 : i32
    %c0_i32_1 = arith.constant 0 : i32
    return %c0_i32, %c0_i32_0 : i32, i32
  }
}

</mosaic_0001>

<bundles_post_ra>
// kernel: _lambda_.1
= control target key start
LH: loop header
LB: loop body
LE: loop exit
PB: predicated region body
PF: predicated region fallthrough
CT: control target
= control target key end

     0   :  { %s3520_s2 = inlined_call_operand.vmem [shape: bf16[128,512], index: 2, kind: input, shape index: {}]   ;;  %s3521_s3 = inlined_call_operand.vmem [shape: bf16[128,512], index: 3, kind: input, shape index: {}]   ;;  %s3522_s0 = inlined_call_operand.vmem [shape: bf16[128,128], index: 0, kind: input, shape index: {}]   ;;  %s3523_s4 = inlined_call_operand.vmem [shape: f32[1,512], index: 4, kind: input, shape index: {}]   ;;  %s3524_s1 = inlined_call_operand.vmem [shape: f32[16,128], index: 1, kind: input, shape index: {}]   ;;  %s3525_s6 = inlined_call_operand.vmem [shape: f32[1,128], index: 6, kind: input, shape index: {}]   ;;  %s3526_s5 = inlined_call_operand.vmem [shape: bf16[128,128], index: 5, kind: input, shape index: {}]   ;;  %s3527_s7 = inlined_call_operand.vmem [shape: f32[8,128], index: 7, kind: output, shape index: {}]  }
   0x1   :  { %v1900_v0 = vld [vmem:[%s3520_s2 + $0xe0] sm:$0xf]  ;;  %v2112_v1 = vld [vmem:[%s3520_s2 + $0xec] sm:$0xf0]  ;;  %v2110_v2 = vld [vmem:[%s3520_s2 + $0xe4] sm:$0xf] }
   0x2   :  { %v1901_v3 = vor.u32 %v2112_v1, %v1900_v0  ;;  %v1902_v4 = vld [vmem:[%s3520_s2 + $0xf0] sm:$0xf0]  ;;  %v1908_v5 = vld [vmem:[%s3520_s2 + $0xe8] sm:$0xf]  ;;  %v2113_v6 = vld [vmem:[%s3520_s2 + $0xf4] sm:$0xf0] }
   0x3   :  { %v1905_v7 = vor.u32 %v2110_v2, %v1902_v4  ;;  %v1909_v8 = vor.u32 %v2113_v6, %v1908_v5  ;;  %v2111_v9 = vld [vmem:[%s3520_s2 + $0xec] sm:$0xf]  ;;  %v1910_v10 = vld [vmem:[%s3520_s2 + $0xf8] sm:$0xf0]  ;;  %v1884_v11 = vld [vmem:[%s3520_s2 + $0xc0] sm:$0xf] }
   0x4   :  { %293 = vmatpush.bf16.msra.mxu0 %v1901_v3  ;;  %v1913_v12 = vor.u32 %v2111_v9, %v1910_v10  ;;  %v2108_v13 = vld [vmem:[%s3520_s2 + $0xcc] sm:$0xf0]  ;;  %v2106_v14 = vld [vmem:[%s3520_s2 + $0xc4] sm:$0xf]  ;;  %v1886_v15 = vld [vmem:[%s3520_s2 + $0xd0] sm:$0xf0] }
   0x5   :  { %342 = vmatpush.bf16.msra.mxu1 %v1905_v7  ;;  %391 = vmatpush.bf16.msra.mxu2 %v1909_v8  ;;  %v1885_v16 = vor.u32 %v2108_v13, %v1884_v11  ;;  %v1889_v17 = vor.u32 %v2106_v14, %v1886_v15  ;;  %v1892_v18 = vld [vmem:[%s3520_s2 + $0xc8] sm:$0xf]  ;;  %v2109_v19 = vld [vmem:[%s3520_s2 + $0xd4] sm:$0xf0]  ;;  %v2107_v20 = vld [vmem:[%s3520_s2 + $0xcc] sm:$0xf] }
   0x6   :  { %440 = vmatpush.bf16.msra.mxu3 %v1913_v12  ;;  %v1893_v21 = vor.u32 %v2109_v19, %v1892_v18  ;;  %v1894_v22 = vld [vmem:[%s3520_s2 + $0xd8] sm:$0xf0]  ;;  %v1868_v23 = vld [vmem:[%s3520_s2 + $0xa0] sm:$0xf]  ;;  %v2104_v24 = vld [vmem:[%s3520_s2 + $0xac] sm:$0xf0] }
   0x7   :  { %v1897_v25 = vor.u32 %v2107_v20, %v1894_v22  ;;  %v2102_v26 = vld [vmem:[%s3520_s2 + $0xa4] sm:$0xf]  ;;  %v1870_v27 = vld [vmem:[%s3520_s2 + $0xb0] sm:$0xf0]  ;;  %v1876_v28 = vld [vmem:[%s3520_s2 + $0xa8] sm:$0xf]  ;;  %v1869_v29 = vor.u32 %v2104_v24, %v1868_v23 }
   0x8   :  { %294 = vmatpush.bf16.msra.mxu0 %v1885_v16  ;;  %v2105_v30 = vld [vmem:[%s3520_s2 + $0xb4] sm:$0xf0]  ;;  %v2103_v31 = vld [vmem:[%s3520_s2 + $0xac] sm:$0xf]  ;;  %v1878_v32 = vld [vmem:[%s3520_s2 + $0xb8] sm:$0xf0]  ;;  %v1873_v33 = vor.u32 %v2102_v26, %v1870_v27 }
   0x9   :  { %343 = vmatpush.bf16.msra.mxu1 %v1889_v17  ;;  %392 = vmatpush.bf16.msra.mxu2 %v1893_v21  ;;  %v1877_v34 = vor.u32 %v2105_v30, %v1876_v28  ;;  %v1852_v35 = vld [vmem:[%s3520_s2 + $0x80] sm:$0xf]  ;;  %v2100_v36 = vld [vmem:[%s3520_s2 + $0x8c] sm:$0xf0]  ;;  %v2098_v37 = vld [vmem:[%s3520_s2 + $0x84] sm:$0xf]  ;;  %v1881_v38 = vor.u32 %v2103_v31, %v1878_v32 }
   0xa   :  { %441 = vmatpush.bf16.msra.mxu3 %v1897_v25  ;;  %v1854_v39 = vld [vmem:[%s3520_s2 + $0x90] sm:$0xf0]  ;;  %v1860_v40 = vld [vmem:[%s3520_s2 + $0x88] sm:$0xf]  ;;  %v2101_v41 = vld [vmem:[%s3520_s2 + $0x94] sm:$0xf0]  ;;  %v1853_v44 = vor.u32 %v2100_v36, %v1852_v35 }
   0xb   :  { %v2099_v42 = vld [vmem:[%s3520_s2 + $0x8c] sm:$0xf]  ;;  %v1862_v43 = vld [vmem:[%s3520_s2 + $0x98] sm:$0xf0]  ;;  %v1857_v45 = vor.u32 %v2098_v37, %v1854_v39  ;;  %v1861_v46 = vor.u32 %v2101_v41, %v1860_v40  ;;  %v1836_v47 = vld [vmem:[%s3520_s2 + $0x60] sm:$0xf] }
   0xc   :  { %295 = vmatpush.bf16.msra.mxu0 %v1869_v29  ;;  %v2096_v48 = vld [vmem:[%s3520_s2 + $0x6c] sm:$0xf0]  ;;  %v2094_v49 = vld [vmem:[%s3520_s2 + $0x64] sm:$0xf]  ;;  %v1865_v50 = vor.u32 %v2099_v42, %v1862_v43  ;;  %v1838_v51 = vld [vmem:[%s3520_s2 + $0x70] sm:$0xf0] }
   0xd   :  { %344 = vmatpush.bf16.msra.mxu1 %v1873_v33  ;;  %393 = vmatpush.bf16.msra.mxu2 %v1877_v34  ;;  %v1844_v52 = vld [vmem:[%s3520_s2 + $0x68] sm:$0xf]  ;;  %v2097_v53 = vld [vmem:[%s3520_s2 + $0x74] sm:$0xf0]  ;;  %v2095_v54 = vld [vmem:[%s3520_s2 + $0x6c] sm:$0xf]  ;;  %v1837_v56 = vor.u32 %v2096_v48, %v1836_v47  ;;  %v1841_v57 = vor.u32 %v2094_v49, %v1838_v51 }
   0xe   :  { %442 = vmatpush.bf16.msra.mxu3 %v1881_v38  ;;  %v1846_v55 = vld [vmem:[%s3520_s2 + $0x78] sm:$0xf0]  ;;  %v1845_v58 = vor.u32 %v2097_v53, %v1844_v52  ;;  %v1820_v59 = vld [vmem:[%s3520_s2 + $0x40] sm:$0xf]  ;;  %v2092_v60 = vld [vmem:[%s3520_s2 + $0x4c] sm:$0xf0] }
   0xf   :  { %v2090_v61 = vld [vmem:[%s3520_s2 + $0x44] sm:$0xf]  ;;  %v1849_v62 = vor.u32 %v2095_v54, %v1846_v55  ;;  %v1822_v63 = vld [vmem:[%s3520_s2 + $0x50] sm:$0xf0]  ;;  %v1828_v0 = vld [vmem:[%s3520_s2 + $0x48] sm:$0xf]  ;;  %v1821_v4 = vor.u32 %v2092_v60, %v1820_v59 }
  0x10   :  { %296 = vmatpush.bf16.msra.mxu0 %v1853_v44  ;;  %v2093_v1 = vld [vmem:[%s3520_s2 + $0x54] sm:$0xf0]  ;;  %v2091_v2 = vld [vmem:[%s3520_s2 + $0x4c] sm:$0xf]  ;;  %v1830_v3 = vld [vmem:[%s3520_s2 + $0x58] sm:$0xf0]  ;;  %v1825_v5 = vor.u32 %v2090_v61, %v1822_v63 }
  0x11   :  { %345 = vmatpush.bf16.msra.mxu1 %v1857_v45  ;;  %394 = vmatpush.bf16.msra.mxu2 %v1861_v46  ;;  %v1829_v6 = vor.u32 %v2093_v1, %v1828_v0  ;;  %v1804_v7 = vld [vmem:[%s3520_s2 + $0x20] sm:$0xf]  ;;  %v2088_v8 = vld [vmem:[%s3520_s2 + $0x2c] sm:$0xf0]  ;;  %v2086_v9 = vld [vmem:[%s3520_s2 + $0x24] sm:$0xf]  ;;  %v1833_v10 = vor.u32 %v2091_v2, %v1830_v3 }
  0x12   :  { %443 = vmatpush.bf16.msra.mxu3 %v1865_v50  ;;  %v1806_v11 = vld [vmem:[%s3520_s2 + $0x30] sm:$0xf0]  ;;  %v1812_v12 = vld [vmem:[%s3520_s2 + $0x28] sm:$0xf]  ;;  %v2089_v13 = vld [vmem:[%s3520_s2 + $0x34] sm:$0xf0]  ;;  %v1805_v16 = vor.u32 %v2088_v8, %v1804_v7 }
  0x13   :  { %v2087_v14 = vld [vmem:[%s3520_s2 + $0x2c] sm:$0xf]  ;;  %v1814_v15 = vld [vmem:[%s3520_s2 + $0x38] sm:$0xf0]  ;;  %v1788_v17 = vld [vmem:[%s3520_s2] sm:$0xf]  ;;  %v1809_v18 = vor.u32 %v2086_v9, %v1806_v11  ;;  %v1813_v19 = vor.u32 %v2089_v13, %v1812_v12 }
  0x14   :  { %297 = vmatpush.bf16.msra.mxu0 %v1837_v56  ;;  %v2084_v20 = vld [vmem:[%s3520_s2 + $0xc] sm:$0xf0]  ;;  %v2082_v21 = vld [vmem:[%s3520_s2 + $0x4] sm:$0xf]  ;;  %v1790_v22 = vld [vmem:[%s3520_s2 + $0x10] sm:$0xf0]  ;;  %v1817_v23 = vor.u32 %v2087_v14, %v1814_v15 }
  0x15   :  { %346 = vmatpush.bf16.msra.mxu1 %v1841_v57  ;;  %395 = vmatpush.bf16.msra.mxu2 %v1845_v58  ;;  %v1796_v24 = vld [vmem:[%s3520_s2 + $0x8] sm:$0xf]  ;;  %v2085_v25 = vld [vmem:[%s3520_s2 + $0x14] sm:$0xf0]  ;;  %v2083_v26 = vld [vmem:[%s3520_s2 + $0xc] sm:$0xf]  ;;  %v1789_v30 = vor.u32 %v2084_v20, %v1788_v17  ;;  %v1793_v33 = vor.u32 %v2082_v21, %v1790_v22 }
  0x16   :  { %444 = vmatpush.bf16.msra.mxu3 %v1849_v62  ;;  %v1798_v27 = vld [vmem:[%s3520_s2 + $0x18] sm:$0xf0]  ;;  %v2028_v28 = vld [vmem:[%s3521_s3 + $0xe0] sm:$0xf]  ;;  %v2144_v29 = vld [vmem:[%s3521_s3 + $0xec] sm:$0xf0]  ;;  %v1797_v34 = vor.u32 %v2085_v25, %v1796_v24 }
  0x17   :  { %v2142_v31 = vld [vmem:[%s3521_s3 + $0xe4] sm:$0xf]  ;;  %v2030_v32 = vld [vmem:[%s3521_s3 + $0xf0] sm:$0xf0]  ;;  %v1801_v36 = vor.u32 %v2083_v26, %v1798_v27  ;;  %v2566_v37 = vor.u32 %v2144_v29, %v2028_v28  ;;  %v2143_v38 = vld [vmem:[%s3521_s3 + $0xec] sm:$0xf] }
  0x18   :  { %298 = vmatpush.bf16.msra.mxu0 %v1821_v4  ;;  %v2074_v35 = vld [vmem:[%s3522_s0] sm:$0xff]  ;;  %v2036_v39 = vld [vmem:[%s3521_s3 + $0xe8] sm:$0xf]  ;;  %v2145_v40 = vld [vmem:[%s3521_s3 + $0xf4] sm:$0xf0]  ;;  %v2577_v41 = vor.u32 %v2142_v31, %v2030_v32 }
  0x19   :  { %347 = vmatpush.bf16.msra.mxu1 %v1825_v5  ;;  %396 = vmatpush.bf16.msra.mxu2 %v1829_v6  ;;  %v2038_v42 = vld [vmem:[%s3521_s3 + $0xf8] sm:$0xf0]  ;;  %v2012_v43 = vld [vmem:[%s3521_s3 + $0xc0] sm:$0xf]  ;;  %v2140_v44 = vld [vmem:[%s3521_s3 + $0xcc] sm:$0xf0]  ;;  %v2594_v47 = vor.u32 %v2145_v40, %v2036_v39 }
  0x1a   :  { %445 = vmatpush.bf16.msra.mxu3 %v1833_v10  ;;  %v2138_v45 = vld [vmem:[%s3521_s3 + $0xc4] sm:$0xf]  ;;  %v2014_v46 = vld [vmem:[%s3521_s3 + $0xd0] sm:$0xf0]  ;;  %v2597_v48 = vor.u32 %v2143_v38, %v2038_v42  ;;  %v2599_v49 = vor.u32 %v2140_v44, %v2012_v43  ;;  %v2020_v50 = vld [vmem:[%s3521_s3 + $0xc8] sm:$0xf] }
  0x1b   :  { %v2141_v51 = vld [vmem:[%s3521_s3 + $0xd4] sm:$0xf0]  ;;  %v2608_v52 = vor.u32 %v2138_v45, %v2014_v46  ;;  %v2139_v53 = vld [vmem:[%s3521_s3 + $0xcc] sm:$0xf]  ;;  %v2022_v54 = vld [vmem:[%s3521_s3 + $0xd8] sm:$0xf0] }
  0x1c   :  { %299 = vmatpush.bf16.msra.mxu0 %v1805_v16  ;;  %v2617_v55 = vor.u32 %v2141_v51, %v2020_v50  ;;  %v1996_v56 = vld [vmem:[%s3521_s3 + $0xa0] sm:$0xf]  ;;  %v2136_v57 = vld [vmem:[%s3521_s3 + $0xac] sm:$0xf0]  ;;  %v2134_v58 = vld [vmem:[%s3521_s3 + $0xa4] sm:$0xf]  ;;  %v2630_v59 = vor.u32 %v2139_v53, %v2022_v54 }
  0x1d   :  { %348 = vmatpush.bf16.msra.mxu1 %v1809_v18  ;;  %397 = vmatpush.bf16.msra.mxu2 %v1813_v19  ;;  %v2632_v60 = vor.u32 %v2136_v57, %v1996_v56  ;;  %v1998_v61 = vld [vmem:[%s3521_s3 + $0xb0] sm:$0xf0]  ;;  %v2135_v62 = vld [vmem:[%s3521_s3 + $0xac] sm:$0xf]  ;;  %v2006_v0 = vld [vmem:[%s3521_s3 + $0xb8] sm:$0xf0] }
  0x1e   :  { %446 = vmatpush.bf16.msra.mxu3 %v1817_v23  ;;  %v2641_v63 = vor.u32 %v2134_v58, %v1998_v61  ;;  %v2004_v1 = vld [vmem:[%s3521_s3 + $0xa8] sm:$0xf]  ;;  %v2137_v2 = vld [vmem:[%s3521_s3 + $0xb4] sm:$0xf0]  ;;  %v2657_v4 = vor.u32 %v2135_v62, %v2006_v0  ;;  %v1980_v6 = vld [vmem:[%s3521_s3 + $0x80] sm:$0xf] }
  0x1f   :  { %v2653_v3 = vor.u32 %v2137_v2, %v2004_v1  ;;  %v2075_v5 = vld [vmem:[%s3522_s0 + $0x8] sm:$0xff]  ;;  %v2132_v7 = vld [vmem:[%s3521_s3 + $0x8c] sm:$0xf0]  ;;  %v2130_v8 = vld [vmem:[%s3521_s3 + $0x84] sm:$0xf] }
  0x20   :  { %300 = vmatpush.bf16.msra.mxu0 %v1789_v30  ;;  %v2674_v9 = vor.u32 %v2132_v7, %v1980_v6  ;;  %v1982_v10 = vld [vmem:[%s3521_s3 + $0x90] sm:$0xf0]  ;;  %v2131_v11 = vld [vmem:[%s3521_s3 + $0x8c] sm:$0xf]  ;;  %v1990_v12 = vld [vmem:[%s3521_s3 + $0x98] sm:$0xf0] }
  0x21   :  { %349 = vmatpush.bf16.msra.mxu1 %v1793_v33  ;;  %398 = vmatpush.bf16.msra.mxu2 %v1797_v34  ;;  %v2685_v13 = vor.u32 %v2130_v8, %v1982_v10  ;;  %v2687_v14 = vor.u32 %v2131_v11, %v1990_v12  ;;  %v1988_v15 = vld [vmem:[%s3521_s3 + $0x88] sm:$0xf]  ;;  %v2133_v16 = vld [vmem:[%s3521_s3 + $0x94] sm:$0xf0]  ;;  %v2076_v18 = vld [vmem:[%s3522_s0 + $0x10] sm:$0xff] }
  0x22   :  { %447 = vmatpush.bf16.msra.mxu3 %v1801_v36  ;;  %v2696_v17 = vor.u32 %v2133_v16, %v1988_v15  ;;  %v1964_v19 = vld [vmem:[%s3521_s3 + $0x60] sm:$0xf]  ;;  %v2128_v20 = vld [vmem:[%s3521_s3 + $0x6c] sm:$0xf0]  ;;  %v2126_v21 = vld [vmem:[%s3521_s3 + $0x64] sm:$0xf] }
  0x23   :  { %301 = vmatmul.bf16.vlgmr.msra.gmra.mxu0 %v2074_v35  ;;  %v2713_v22 = vor.u32 %v2128_v20, %v1964_v19  ;;  %v1966_v23 = vld [vmem:[%s3521_s3 + $0x70] sm:$0xf0]  ;;  %v2127_v24 = vld [vmem:[%s3521_s3 + $0x6c] sm:$0xf]  ;;  %v1974_v25 = vld [vmem:[%s3521_s3 + $0x78] sm:$0xf0] }
  0x24   :  { %755 = vmatpush.bf16.msrb.mxu0 %v2566_v37  ;;  %350 = vmatmul.bf16.vlgmr.msra.gmra.mxu1 %v2074_v35  ;;  %v2724_v26 = vor.u32 %v2126_v21, %v1966_v23  ;;  %v2726_v27 = vor.u32 %v2127_v24, %v1974_v25  ;;  %v1972_v28 = vld [vmem:[%s3521_s3 + $0x68] sm:$0xf]  ;;  %v2129_v29 = vld [vmem:[%s3521_s3 + $0x74] sm:$0xf0]  ;;  %v1948_v32 = vld [vmem:[%s3521_s3 + $0x40] sm:$0xf] }
  0x25   :  { %769 = vmatpush.bf16.msrb.mxu1 %v2577_v41  ;;  %399 = vmatmul.bf16.vlgmr.msra.gmra.mxu2 %v2074_v35  ;;  %v2735_v30 = vor.u32 %v2129_v29, %v1972_v28  ;;  %v2077_v31 = vld [vmem:[%s3522_s0 + $0x18] sm:$0xff]  ;;  %v2124_v33 = vld [vmem:[%s3521_s3 + $0x4c] sm:$0xf0]  ;;  %v2122_v34 = vld [vmem:[%s3521_s3 + $0x44] sm:$0xf]  ;;  %v2318_v29 = vmov 0  }
  0x26   :  { %448 = vmatmul.bf16.vlgmr.msra.gmra.mxu3 %v2074_v35  ;;  %783 = vmatpush.bf16.msrb.mxu2 %v2594_v47  ;;  %v2752_v35 = vor.u32 %v2124_v33, %v1948_v32  ;;  %v1950_v36 = vld [vmem:[%s3521_s3 + $0x50] sm:$0xf0]  ;;  %v2123_v38 = vld [vmem:[%s3521_s3 + $0x4c] sm:$0xf]  ;;  %v1958_v39 = vld [vmem:[%s3521_s3 + $0x58] sm:$0xf0] }
  0x27   :  { %797 = vmatpush.bf16.msrb.mxu3 %v2597_v48  ;;  %v2763_v40 = vor.u32 %v2122_v34, %v1950_v36  ;;  %v2765_v42 = vor.u32 %v2123_v38, %v1958_v39  ;;  %v1956_v43 = vld [vmem:[%s3521_s3 + $0x48] sm:$0xf]  ;;  %v2125_v44 = vld [vmem:[%s3521_s3 + $0x54] sm:$0xf0]  ;;  %v2078_v46 = vld [vmem:[%s3522_s0 + $0x20] sm:$0xff] }
  0x28   :  { %756 = vmatpush.bf16.msrb.mxu0 %v2599_v49  ;;  %v2774_v45 = vor.u32 %v2125_v44, %v1956_v43  ;;  %v1932_v50 = vld [vmem:[%s3521_s3 + $0x20] sm:$0xf]  ;;  %v2120_v51 = vld [vmem:[%s3521_s3 + $0x2c] sm:$0xf0]  ;;  %v2118_v53 = vld [vmem:[%s3521_s3 + $0x24] sm:$0xf] }
  0x29   :  { %770 = vmatpush.bf16.msrb.mxu1 %v2608_v52  ;;  %v2791_v54 = vor.u32 %v2120_v51, %v1932_v50  ;;  %v1934_v56 = vld [vmem:[%s3521_s3 + $0x30] sm:$0xf0]  ;;  %v2119_v57 = vld [vmem:[%s3521_s3 + $0x2c] sm:$0xf]  ;;  %v1942_v58 = vld [vmem:[%s3521_s3 + $0x38] sm:$0xf0] }
  0x2a   :  { %784 = vmatpush.bf16.msrb.mxu2 %v2617_v55  ;;  %v2802_v61 = vor.u32 %v2118_v53, %v1934_v56  ;;  %v2804_v62 = vor.u32 %v2119_v57, %v1942_v58  ;;  %v1940_v0 = vld [vmem:[%s3521_s3 + $0x28] sm:$0xf]  ;;  %v2121_v1 = vld [vmem:[%s3521_s3 + $0x34] sm:$0xf0]  ;;  %v1916_v6 = vld [vmem:[%s3521_s3] sm:$0xf] }
  0x2b   :  { %798 = vmatpush.bf16.msrb.mxu3 %v2630_v59  ;;  %v2813_v2 = vor.u32 %v2121_v1, %v1940_v0  ;;  %v2116_v7 = vld [vmem:[%s3521_s3 + $0xc] sm:$0xf0]  ;;  %v2114_v8 = vld [vmem:[%s3521_s3 + $0x4] sm:$0xf]  ;;  %v1918_v11 = vld [vmem:[%s3521_s3 + $0x10] sm:$0xf0] }
  0x2c   :  { %757 = vmatpush.bf16.msrb.mxu0 %v2632_v60  ;;  %v2830_v10 = vor.u32 %v2116_v7, %v1916_v6  ;;  %v2115_v12 = vld [vmem:[%s3521_s3 + $0xc] sm:$0xf]  ;;  %v1926_v15 = vld [vmem:[%s3521_s3 + $0x18] sm:$0xf0]  ;;  %v2841_v16 = vor.u32 %v2114_v8, %v1918_v11  ;;  %v1924_v19 = vld [vmem:[%s3521_s3 + $0x8] sm:$0xf] }
  0x2d   :  { %771 = vmatpush.bf16.msrb.mxu1 %v2641_v63  ;;  %v2117_v20 = vld [vmem:[%s3521_s3 + $0x14] sm:$0xf0]  ;;  %v2080_v23 = vld [vmem:[%s3522_s0 + $0x30] sm:$0xff] }
  0x2e   :  { %785 = vmatpush.bf16.msrb.mxu2 %v2653_v3  ;;  %v2852_v21 = vor.u32 %v2117_v20, %v1924_v19  ;;  %v2081_v24 = vld [vmem:[%s3522_s0 + $0x38] sm:$0xff] }
  0x2f   :  { %799 = vmatpush.bf16.msrb.mxu3 %v2657_v4 }
  0x30   :  { %758 = vmatpush.bf16.msrb.mxu0 %v2674_v9 }
  0x31   :  { %772 = vmatpush.bf16.msrb.mxu1 %v2685_v13 }
  0x32   :  { %786 = vmatpush.bf16.msrb.mxu2 %v2696_v17 }
  0x33   :  { %306 = vmatmul.bf16.gmra.mxu0 %v2075_v5  ;;  %800 = vmatpush.bf16.msrb.mxu3 %v2687_v14 }
  0x34   :  { %355 = vmatmul.bf16.gmra.mxu1 %v2075_v5  ;;  %759 = vmatpush.bf16.msrb.mxu0 %v2713_v22 }
  0x35   :  { %404 = vmatmul.bf16.gmra.mxu2 %v2075_v5  ;;  %773 = vmatpush.bf16.msrb.mxu1 %v2724_v26 }
  0x36   :  { %453 = vmatmul.bf16.gmra.mxu3 %v2075_v5  ;;  %787 = vmatpush.bf16.msrb.mxu2 %v2735_v30  ;;  %v2079_v5 = vld [vmem:[%s3522_s0 + $0x28] sm:$0xff] }
  0x37   :  { %801 = vmatpush.bf16.msrb.mxu3 %v2726_v27 }
  0x38   :  { %760 = vmatpush.bf16.msrb.mxu0 %v2752_v35 }
  0x39   :  { %774 = vmatpush.bf16.msrb.mxu1 %v2763_v40 }
  0x3a   :  { %788 = vmatpush.bf16.msrb.mxu2 %v2774_v45 }
  0x3b   :  { %802 = vmatpush.bf16.msrb.mxu3 %v2765_v42 }
  0x3c   :  { %761 = vmatpush.bf16.msrb.mxu0 %v2791_v54 }
  0x3d   :  { %775 = vmatpush.bf16.msrb.mxu1 %v2802_v61 }
  0x3e   :  { %789 = vmatpush.bf16.msrb.mxu2 %v2813_v2 }
  0x3f   :  { %803 = vmatpush.bf16.msrb.mxu3 %v2804_v62 }
  0x40   :  { %762 = vmatpush.bf16.msrb.mxu0 %v2830_v10 }
  0x41   :  { %776 = vmatpush.bf16.msrb.mxu1 %v2841_v16 }
  0x42   :  { %790 = vmatpush.bf16.msrb.mxu2 %v2852_v21 }
  0x43   :  { %311 = vmatmul.bf16.gmra.mxu0 %v2076_v18 }
  0x44   :  { %360 = vmatmul.bf16.gmra.mxu1 %v2076_v18  ;;  %870 = vmatpush.bf16.msra.mxu0 %v2566_v37 }
  0x45   :  { %409 = vmatmul.bf16.gmra.mxu2 %v2076_v18  ;;  %884 = vmatpush.bf16.msra.mxu1 %v2577_v41 }
  0x46   :  { %458 = vmatmul.bf16.gmra.mxu3 %v2076_v18  ;;  %v2843_v18 = vor.u32 %v2115_v12, %v1926_v15  ;;  %898 = vmatpush.bf16.msra.mxu2 %v2594_v47 }
  0x48   :  { %804 = vmatpush.bf16.msrb.mxu3 %v2843_v18  ;;  %871 = vmatpush.bf16.msra.mxu0 %v2599_v49 }
  0x49   :  { %885 = vmatpush.bf16.msra.mxu1 %v2608_v52 }
  0x4a   :  { %899 = vmatpush.bf16.msra.mxu2 %v2617_v55 }
  0x4c   :  { %912 = vmatpush.bf16.msra.mxu3 %v2597_v48  ;;  %872 = vmatpush.bf16.msra.mxu0 %v2632_v60 }
  0x4d   :  { %886 = vmatpush.bf16.msra.mxu1 %v2641_v63 }
  0x4e   :  { %900 = vmatpush.bf16.msra.mxu2 %v2653_v3 }
  0x50   :  { %913 = vmatpush.bf16.msra.mxu3 %v2630_v59  ;;  %873 = vmatpush.bf16.msra.mxu0 %v2674_v9 }
  0x51   :  { %887 = vmatpush.bf16.msra.mxu1 %v2685_v13 }
  0x52   :  { %901 = vmatpush.bf16.msra.mxu2 %v2696_v17 }
  0x53   :  { %316 = vmatmul.bf16.gmra.mxu0 %v2077_v31 }
  0x54   :  { %365 = vmatmul.bf16.gmra.mxu1 %v2077_v31  ;;  %914 = vmatpush.bf16.msra.mxu3 %v2657_v4 }
  0x55   :  { %414 = vmatmul.bf16.gmra.mxu2 %v2077_v31  ;;  %874 = vmatpush.bf16.msra.mxu0 %v2713_v22 }
  0x56   :  { %463 = vmatmul.bf16.gmra.mxu3 %v2077_v31  ;;  %888 = vmatpush.bf16.msra.mxu1 %v2724_v26 }
  0x57   :  { %902 = vmatpush.bf16.msra.mxu2 %v2735_v30 }
  0x58   :  { %915 = vmatpush.bf16.msra.mxu3 %v2687_v14 }
  0x59   :  { %875 = vmatpush.bf16.msra.mxu0 %v2752_v35 }
  0x5a   :  { %889 = vmatpush.bf16.msra.mxu1 %v2763_v40 }
  0x5b   :  { %903 = vmatpush.bf16.msra.mxu2 %v2774_v45 }
  0x5c   :  { %916 = vmatpush.bf16.msra.mxu3 %v2726_v27 }
  0x5d   :  { %876 = vmatpush.bf16.msra.mxu0 %v2791_v54 }
  0x5e   :  { %890 = vmatpush.bf16.msra.mxu1 %v2802_v61 }
  0x5f   :  { %904 = vmatpush.bf16.msra.mxu2 %v2813_v2 }
  0x60   :  { %917 = vmatpush.bf16.msra.mxu3 %v2765_v42 }
  0x61   :  { %877 = vmatpush.bf16.msra.mxu0 %v2830_v10 }
  0x62   :  { %891 = vmatpush.bf16.msra.mxu1 %v2841_v16 }
  0x63   :  { %321 = vmatmul.bf16.gmra.mxu0 %v2078_v46  ;;  %905 = vmatpush.bf16.msra.mxu2 %v2852_v21 }
  0x64   :  { %370 = vmatmul.bf16.gmra.mxu1 %v2078_v46  ;;  %918 = vmatpush.bf16.msra.mxu3 %v2804_v62 }
  0x65   :  { %419 = vmatmul.bf16.gmra.mxu2 %v2078_v46 }
  0x66   :  { %468 = vmatmul.bf16.gmra.mxu3 %v2078_v46 }
  0x68   :  { %919 = vmatpush.bf16.msra.mxu3 %v2843_v18 }
  0x73   :  { %326 = vmatmul.bf16.gmra.mxu0 %v2079_v5 }
  0x74   :  { %375 = vmatmul.bf16.gmra.mxu1 %v2079_v5 }
  0x75   :  { %424 = vmatmul.bf16.gmra.mxu2 %v2079_v5 }
  0x76   :  { %473 = vmatmul.bf16.gmra.mxu3 %v2079_v5 }
  0x83   :  { %331 = vmatmul.bf16.gmra.mxu0 %v2080_v23 }
  0x84   :  { %380 = vmatmul.bf16.gmra.mxu1 %v2080_v23 }
  0x85   :  { %429 = vmatmul.bf16.gmra.mxu2 %v2080_v23 }
  0x86   :  { %478 = vmatmul.bf16.gmra.mxu3 %v2080_v23 }
  0x93   :  { %336 = vmatmul.bf16.gmra.mxu0 %v2081_v24 }
  0x94   :  { %385 = vmatmul.bf16.gmra.mxu1 %v2081_v24 }
  0x95   :  { %434 = vmatmul.bf16.gmra.mxu2 %v2081_v24 }
  0x96   :  { %483 = vmatmul.bf16.gmra.mxu3 %v2081_v24 }
  0xa0   :  { %v2895_v25 = vpop.f32.mrf.mxu0 }
  0xa1   :  { %v2897_v28 = vpop.f32.mrf.mxu1 }
  0xa3   :  { %763 = vmatmul.bf16.vlgmr.msrb.gmra.mxu0 %v2318_v29 }
  0xa4   :  { %777 = vmatmul.bf16.vlgmr.msrb.gmra.mxu1 %v2318_v29  ;;  %985 = vmatpush.bf16.msrb.mxu0 %v2566_v37 }
  0xa5   :  { %791 = vmatmul.bf16.vlgmr.msrb.gmra.mxu2 %v2318_v29  ;;  %999 = vmatpush.bf16.msrb.mxu1 %v2577_v41 }
  0xa6   :  { %805 = vmatmul.bf16.vlgmr.msrb.gmra.mxu3 %v2318_v29  ;;  %1013 = vmatpush.bf16.msrb.mxu2 %v2594_v47 }
  0xa7   :  { %1027 = vmatpush.bf16.msrb.mxu3 %v2597_v48 }
  0xa8   :  { %v2902_v31 = vpop.f32.mrf.mxu2  ;;  %v2907_v33 = vpop.f32.mrf.mxu0  ;;  %986 = vmatpush.bf16.msrb.mxu0 %v2599_v49 }
  0xa9   :  { %v2905_v32 = vpop.f32.mrf.mxu3  ;;  %v2909_v34 = vpop.f32.mrf.mxu1  ;;  %1000 = vmatpush.bf16.msrb.mxu1 %v2608_v52 }
  0xaa   :  { %1014 = vmatpush.bf16.msrb.mxu2 %v2617_v55 }
  0xab   :  { %1028 = vmatpush.bf16.msrb.mxu3 %v2630_v59 }
  0xac   :  { %987 = vmatpush.bf16.msrb.mxu0 %v2632_v60 }
  0xad   :  { %1001 = vmatpush.bf16.msrb.mxu1 %v2641_v63 }
  0xae   :  { %1015 = vmatpush.bf16.msrb.mxu2 %v2653_v3 }
  0xaf   :  { %1029 = vmatpush.bf16.msrb.mxu3 %v2657_v4 }
  0xb0   :  { %v2918_v36 = vpop.f32.mrf.mxu2  ;;  %v2923_v39 = vpop.f32.mrf.mxu0  ;;  %988 = vmatpush.bf16.msrb.mxu0 %v2674_v9 }
  0xb1   :  { %v2921_v38 = vpop.f32.mrf.mxu3  ;;  %v2925_v43 = vpop.f32.mrf.mxu1  ;;  %1002 = vmatpush.bf16.msrb.mxu1 %v2685_v13 }
  0xb2   :  { %1016 = vmatpush.bf16.msrb.mxu2 %v2696_v17 }
  0xb3   :  { %1030 = vmatpush.bf16.msrb.mxu3 %v2687_v14 }
  0xb4   :  { %989 = vmatpush.bf16.msrb.mxu0 %v2713_v22 }
  0xb5   :  { %1003 = vmatpush.bf16.msrb.mxu1 %v2724_v26 }
  0xb6   :  { %1017 = vmatpush.bf16.msrb.mxu2 %v2735_v30 }
  0xb7   :  { %1031 = vmatpush.bf16.msrb.mxu3 %v2726_v27 }
  0xb8   :  { %v2934_v44 = vpop.f32.mrf.mxu2  ;;  %v2939_v50 = vpop.f32.mrf.mxu0  ;;  %990 = vmatpush.bf16.msrb.mxu0 %v2752_v35 }
  0xb9   :  { %v2937_v46 = vpop.f32.mrf.mxu3  ;;  %v2941_v51 = vpop.f32.mrf.mxu1  ;;  %1004 = vmatpush.bf16.msrb.mxu1 %v2763_v40 }
  0xba   :  { %3528 = vst [vmem:[#allocation3_spill] sm:$0xff] %v2941_v51  ;;  %1018 = vmatpush.bf16.msrb.mxu2 %v2774_v45 }
  0xbb   :  { %1032 = vmatpush.bf16.msrb.mxu3 %v2765_v42 }
  0xbc   :  { %991 = vmatpush.bf16.msrb.mxu0 %v2791_v54 }
  0xbd   :  { %1005 = vmatpush.bf16.msrb.mxu1 %v2802_v61 }
  0xbe   :  { %1019 = vmatpush.bf16.msrb.mxu2 %v2813_v2 }
  0xbf   :  { %1033 = vmatpush.bf16.msrb.mxu3 %v2804_v62 }
  0xc0   :  { %v2950_v53 = vpop.f32.mrf.mxu2  ;;  %v2955_v57 = vpop.f32.mrf.mxu0  ;;  %992 = vmatpush.bf16.msrb.mxu0 %v2830_v10 }
  0xc1   :  { %3529 = vst [vmem:[#allocation4_spill] sm:$0xff] %v2950_v53  ;;  %v2953_v56 = vpop.f32.mrf.mxu3  ;;  %v2957_v58 = vpop.f32.mrf.mxu1  ;;  %1006 = vmatpush.bf16.msrb.mxu1 %v2841_v16 }
  0xc2   :  { %3530 = vst [vmem:[#allocation5_spill] sm:$0xff] %v2953_v56  ;;  %1020 = vmatpush.bf16.msrb.mxu2 %v2852_v21 }
  0xc3   :  { %3531 = vst [vmem:[#allocation6_spill] sm:$0xff] %v2955_v57  ;;  %1034 = vmatpush.bf16.msrb.mxu3 %v2843_v18 }
  0xc4   :  { %3532 = vst [vmem:[#allocation7_spill] sm:$0xff] %v2957_v58 }
  0xc8   :  { %v2963_v0 = vpop.f32.mrf.mxu2  ;;  %v2967_v5 = vpop.f32.mrf.mxu0 }
  0xc9   :  { %3533 = vst [vmem:[#allocation8_spill] sm:$0xff] %v2963_v0  ;;  %v2965_v1 = vpop.f32.mrf.mxu3  ;;  %v2969_v6 = vpop.f32.mrf.mxu1 }
  0xca   :  { %3534 = vst [vmem:[#allocation9_spill] sm:$0xff] %v2965_v1 }
  0xcb   :  { %3535 = vst [vmem:[#allocation10_spill] sm:$0xff] %v2967_v5 }
  0xcc   :  { %3536 = vst [vmem:[#allocation11_spill] sm:$0xff] %v2969_v6 }
  0xd0   :  { %v2971_v7 = vpop.f32.mrf.mxu2  ;;  %v2975_v11 = vpop.f32.mrf.mxu0 }
  0xd1   :  { %3537 = vst [vmem:[#allocation12_spill] sm:$0xff] %v2971_v7  ;;  %v2973_v8 = vpop.f32.mrf.mxu3  ;;  %v2977_v12 = vpop.f32.mrf.mxu1 }
  0xd2   :  { %3538 = vst [vmem:[#allocation13_spill] sm:$0xff] %v2973_v8 }
  0xd3   :  { %3539 = vst [vmem:[#allocation14_spill] sm:$0xff] %v2975_v11 }
  0xd4   :  { %3540 = vst [vmem:[#allocation15_spill] sm:$0xff] %v2977_v12 }
  0xd8   :  { %v2979_v15 = vpop.f32.mrf.mxu2  ;;  %v2983_v20 = vpop.f32.mrf.mxu0 }
  0xd9   :  { %3541 = vst [vmem:[#allocation16_spill] sm:$0xff] %v2979_v15  ;;  %v2981_v19 = vpop.f32.mrf.mxu3  ;;  %v2985_v23 = vpop.f32.mrf.mxu1 }
  0xda   :  { %3542 = vst [vmem:[#allocation17_spill] sm:$0xff] %v2981_v19 }
  0xdb   :  { %3543 = vst [vmem:[#allocation18_spill] sm:$0xff] %v2983_v20 }
  0xdc   :  { %3544 = vst [vmem:[#allocation19_spill] sm:$0xff] %v2985_v23 }
  0xe0   :  { %v2987_v24 = vpop.f32.mrf.mxu2  ;;  %v2991_v6 = vpop.f32.mrf.mxu0 }
  0xe1   :  { %3545 = vst [vmem:[#allocation20_spill] sm:$0xff] %v2987_v24  ;;  %v2989_v29 = vpop.f32.mrf.mxu3  ;;  %v2993_v7 = vpop.f32.mrf.mxu1 }
  0xe2   :  { %3546 = vst [vmem:[#allocation21_spill] sm:$0xff] %v2989_v29 }
  0xe3   :  { %3547 = vst [vmem:[#allocation22_spill] sm:$0xff] %v2991_v6 }
  0xe4   :  { %3548 = vst [vmem:[#allocation23_spill] sm:$0xff] %v2993_v7 }
  0xe8   :  { %v2995_v8 = vpop.f32.mrf.mxu2  ;;  %v2999_v12 = vpop.f32.mrf.mxu0 }
  0xe9   :  { %3549 = vst [vmem:[#allocation24_spill] sm:$0xff] %v2995_v8  ;;  %v2997_v11 = vpop.f32.mrf.mxu3  ;;  %v3001_v15 = vpop.f32.mrf.mxu1 }
  0xea   :  { %3550 = vst [vmem:[#allocation25_spill] sm:$0xff] %v2997_v11 }
  0xeb   :  { %3551 = vst [vmem:[#allocation26_spill] sm:$0xff] %v2999_v12 }
  0xec   :  { %3552 = vst [vmem:[#allocation27_spill] sm:$0xff] %v3001_v15 }
  0xf0   :  { %v3003_v19 = vpop.f32.mrf.mxu2  ;;  %v3007_v23 = vpop.f32.mrf.mxu0 }
  0xf1   :  { %3553 = vst [vmem:[#allocation28_spill] sm:$0xff] %v3003_v19  ;;  %v3005_v20 = vpop.f32.mrf.mxu3  ;;  %v3009_v24 = vpop.f32.mrf.mxu1 }
  0xf2   :  { %3554 = vst [vmem:[#allocation29_spill] sm:$0xff] %v3005_v20 }
  0xf3   :  { %3555 = vst [vmem:[#allocation30_spill] sm:$0xff] %v3007_v23 }
  0xf4   :  { %3556 = vst [vmem:[#allocation31_spill] sm:$0xff] %v3009_v24 }
  0xf8   :  { %v3011_v29 = vpop.f32.mrf.mxu2  ;;  %v3015_v7 = vpop.f32.mrf.mxu0 }
  0xf9   :  { %3557 = vst [vmem:[#allocation32_spill] sm:$0xff] %v3011_v29  ;;  %v3013_v6 = vpop.f32.mrf.mxu3  ;;  %v3017_v8 = vpop.f32.mrf.mxu1 }
  0xfa   :  { %3558 = vst [vmem:[#allocation33_spill] sm:$0xff] %v3013_v6 }
  0xfb   :  { %3559 = vst [vmem:[#allocation34_spill] sm:$0xff] %v3015_v7 }
  0xfc   :  { %3560 = vst [vmem:[#allocation35_spill] sm:$0xff] %v3017_v8 }
 0x100   :  { %v3019_v11 = vpop.f32.mrf.mxu2  ;;  %v3023_v15 = vpop.f32.mrf.mxu0 }
 0x101   :  { %3561 = vst [vmem:[#allocation36_spill] sm:$0xff] %v3019_v11  ;;  %v3021_v12 = vpop.f32.mrf.mxu3  ;;  %v3025_v19 = vpop.f32.mrf.mxu1 }
 0x102   :  { %3562 = vst [vmem:[#allocation37_spill] sm:$0xff] %v3021_v12 }
 0x103   :  { %3563 = vst [vmem:[#allocation38_spill] sm:$0xff] %v3023_v15 }
 0x104   :  { %3564 = vst [vmem:[#allocation39_spill] sm:$0xff] %v3025_v19 }
 0x108   :  { %v3027_v20 = vpop.f32.mrf.mxu2  ;;  %v3031_v24 = vpop.f32.mrf.mxu0 }
 0x109   :  { %3565 = vst [vmem:[#allocation40_spill] sm:$0xff] %v3027_v20  ;;  %v3029_v23 = vpop.f32.mrf.mxu3  ;;  %v3033_v29 = vpop.f32.mrf.mxu1  ;;  %v75_v20 = vld [vmem:[%s3523_s4] sm:$0xf] }
 0x10a   :  { %3566 = vst [vmem:[#allocation41_spill] sm:$0xff] %v3029_v23  ;;  %v3066_v1 = vperm.slane %v75_v20, 3  ;;  %v3068_v58 = vperm.slane %v75_v20, 2 }
 0x10b   :  { %3567 = vst [vmem:[#allocation42_spill] sm:$0xff] %v3031_v24 }
 0x10c   :  { %3568 = vst [vmem:[#allocation43_spill] sm:$0xff] %v3033_v29  ;;  %v3054_v29 = vperm.slane %v75_v20, 0 }
 0x110   :  { %v3035_v6 = vpop.f32.mrf.mxu2  ;;  %v3039_v8 = vpop.f32.mrf.mxu0 }
 0x111   :  { %3569 = vst [vmem:[#allocation44_spill] sm:$0xff] %v3035_v6  ;;  %v3037_v7 = vpop.f32.mrf.mxu3  ;;  %v3041_v11 = vpop.f32.mrf.mxu1  ;;  %v3056_v6 = vperm.slane %v75_v20, 1 }
 0x112   :  { %3570 = vst [vmem:[#allocation45_spill] sm:$0xff] %v3037_v7 }
 0x113   :  { %3571 = vst [vmem:[#allocation46_spill] sm:$0xff] %v3039_v8  ;;  %v303_v8 = vadd.f32 %v2895_v25, %v3054_v29  ;;  %v450_v25 = vadd.f32 %v2905_v32, %v3066_v1 }
 0x114   :  { %3572 = vst [vmem:[#allocation47_spill] sm:$0xff] %v3041_v11 }
 0x118   :  { %v3043_v12 = vpop.f32.mrf.mxu2  ;;  %v3050_v23 = vpop.f32.mrf.mxu0 }
 0x119   :  { %3573 = vst [vmem:[#allocation48_spill] sm:$0xff] %v3043_v12  ;;  %v3048_v19 = vpop.f32.mrf.mxu3  ;;  %v3052_v24 = vpop.f32.mrf.mxu1  ;;  %v352_v12 = vadd.f32 %v2897_v28, %v3056_v6  ;;  %v305_v28 = vadd.f32 %v2907_v33, %v3054_v29 }
 0x11a   :  { %3574 = vst [vmem:[#allocation49_spill] sm:$0xff] %v3048_v19 }
 0x11b   :  { %3575 = vst [vmem:[#allocation50_spill] sm:$0xff] %v3050_v23 }
 0x11c   :  { %3576 = vst [vmem:[#allocation51_spill] sm:$0xff] %v3052_v24 }
 0x120   :  { %v3060_v11 = vpop.f32.mrf.mxu2  ;;  %v764_v15 = vpop.f32.mrf.mxu0 }
 0x121   :  { %3577 = vst [vmem:[#allocation52_spill] sm:$0xff] %v3060_v11  ;;  %v3064_v7 = vpop.f32.mrf.mxu3  ;;  %v811_v19 = vadd.f32 %v764_v15, %v303_v8  ;;  %v778_v5 = vpop.f32.mrf.mxu1  ;;  %v354_v8 = vadd.f32 %v2909_v34, %v3056_v6  ;;  %v403_v34 = vadd.f32 %v2918_v36, %v3068_v58 }
 0x122   :  { %3578 = vst [vmem:[#allocation53_spill] sm:$0xff] %v3064_v7  ;;  %v812_v23 = vadd.f32 %v778_v5, %v352_v12 }
 0x123   :  { %v819_v24 = vmul.f32 0.5, %v811_v19 }
 0x124   :  { %v820_v0 = vmul.f32 0.5, %v812_v23 }
 0x125   :  { %2156 = vtanh.f32 %v819_v24 }
 0x126   :  { %2158 = vtanh.f32 %v820_v0  ;;  %v401_v0 = vadd.f32 %v2902_v31, %v3068_v58 }
 0x128   :  { %v792_v11 = vpop.f32.mrf.mxu2  ;;  %v766_v5 = vpop.f32.mrf.mxu0 }
 0x129   :  { %v806_v15 = vpop.f32.mrf.mxu3  ;;  %v815_v7 = vadd.f32 %v766_v5, %v305_v28  ;;  %v780_v19 = vpop.f32.mrf.mxu1  ;;  %v813_v53 = vadd.f32 %v792_v11, %v401_v0 }
 0x12a   :  { %v814_v12 = vadd.f32 %v806_v15, %v450_v25  ;;  %v816_v23 = vadd.f32 %v780_v19, %v354_v8  ;;  %v452_v25 = vadd.f32 %v2921_v38, %v3066_v1 }
 0x12b   :  { %v2157_v24 = vpop.eup %2156  ;;  %v822_v20 = vmul.f32 0.5, %v815_v7 }
 0x12c   :  { %2160 = vtanh.f32 %v814_v12  ;;  %v2159_v32 = vpop.eup %2158  ;;  %v831_v57 = vmul.f32 0.5, %v2157_v24  ;;  %v823_v56 = vmul.f32 0.5, %v816_v23  ;;  %v821_v12 = vmul.f32 0.5, %v813_v53 }
 0x12d   :  { %v832_v33 = vmul.f32 0.5, %v2159_v32  ;;  %2162 = vtanh.f32 %v822_v20 }
 0x12e   :  { %v837_v51 = vadd.f32 0.5, %v831_v57  ;;  %2164 = vtanh.f32 %v823_v56 }
 0x12f   :  { %v838_v28 = vadd.f32 0.5, %v832_v33 }
 0x130   :  { %v794_v8 = vpop.f32.mrf.mxu2 }
 0x131   :  { %v817_v15 = vadd.f32 %v794_v8, %v403_v34  ;;  %v808_v31 = vpop.f32.mrf.mxu3  ;;  %v845_v7 = vmul.f32 0.0, %v838_v28 }
 0x132   :  { %v2161_v5 = vpop.eup %2160  ;;  %v818_v19 = vadd.f32 %v808_v31, %v452_v25 }
 0x133   :  { %v847_v23 = vmul.f32 %v2161_v5, %v837_v51  ;;  %v824_v24 = vmul.f32 0.5, %v817_v15  ;;  %v2163_v11 = vpop.eup %2162 }
 0x134   :  { %2166 = vtanh.f32 %v818_v19  ;;  %v2165_v0 = vpop.eup %2164  ;;  %v834_v36 = vmul.f32 0.5, %v2163_v11  ;;  %v357_v11 = vadd.f32 %v2925_v43, %v3056_v6 }
 0x135   :  { %v3082_v20 = vadd.f32 %v847_v23, %v845_v7  ;;  %2168 = vtanh.f32 %v821_v12  ;;  %v835_v56 = vmul.f32 0.5, %v2165_v0 }
 0x136   :  { %v840_v57 = vadd.f32 0.5, %v834_v36  ;;  %2170 = vtanh.f32 %v824_v24  ;;  %v308_v24 = vadd.f32 %v2923_v39, %v3054_v29  ;;  %v310_v39 = vadd.f32 %v2939_v50, %v3054_v29 }
 0x137   :  { %v841_v38 = vadd.f32 0.5, %v835_v56  ;;  %2172 = vtanh.f32 %v3082_v20 }
 0x139   :  { %v846_v33 = vmul.f32 0.0, %v841_v38 }
 0x13a   :  { %v2167_v32 = vpop.eup %2166 }
 0x13b   :  { %v848_v34 = vmul.f32 %v2167_v32, %v840_v57  ;;  %v2169_v8 = vpop.eup %2168 }
 0x13c   :  { %v2171_v28 = vpop.eup %2170  ;;  %v833_v53 = vmul.f32 0.5, %v2169_v8  ;;  %v3579_v8 = vld [vmem:[#allocation3_spill] sm:$0xff] }
 0x13d   :  { %v3085_v51 = vadd.f32 %v848_v34, %v846_v33  ;;  %v836_v25 = vmul.f32 0.5, %v2171_v28  ;;  %v2173_v15 = vpop.eup %2172  ;;  %v406_v33 = vadd.f32 %v2934_v44, %v3068_v58  ;;  %v455_v34 = vadd.f32 %v2937_v46, %v3066_v1 }
 0x13e   :  { %v839_v31 = vadd.f32 0.5, %v833_v53  ;;  %v359_v43 = vadd.f32 %v3579_v8, %v3056_v6 }
 0x13f   :  { %2174 = vtanh.f32 %v3085_v51  ;;  %v842_v5 = vadd.f32 0.5, %v836_v25 }
 0x140   :  { %v3088_v12 = vmul.f32 %v2173_v15, %v839_v31 }
 0x145   :  { %v2175_v7 = vpop.eup %2174 }
 0x146   :  { %v3090_v19 = vmul.f32 %v2175_v7, %v842_v5 }
 0x148   :  { %v869_v23 = vpack.c.bf16 %v3090_v19, %v3088_v12 }
 0x14a   :  { %878 = vmatmul.bf16.vlgmr.msra.gmra.mxu0 %v869_v23  ;;  %892 = vmatmul.bf16.vlgmr.msra.gmra.mxu1 %v869_v23 }
 0x14b   :  { %906 = vmatmul.bf16.vlgmr.msra.gmra.mxu2 %v869_v23  ;;  %920 = vmatmul.bf16.vlgmr.msra.gmra.mxu3 %v869_v23 }
 0x14c   :  { %1100 = vmatpush.bf16.msra.mxu0 %v2566_v37  ;;  %1114 = vmatpush.bf16.msra.mxu1 %v2577_v41 }
 0x14d   :  { %1128 = vmatpush.bf16.msra.mxu2 %v2594_v47  ;;  %1142 = vmatpush.bf16.msra.mxu3 %v2597_v48 }
 0x150   :  { %1101 = vmatpush.bf16.msra.mxu0 %v2599_v49  ;;  %1115 = vmatpush.bf16.msra.mxu1 %v2608_v52 }
 0x151   :  { %1129 = vmatpush.bf16.msra.mxu2 %v2617_v55  ;;  %1143 = vmatpush.bf16.msra.mxu3 %v2630_v59 }
 0x154   :  { %1102 = vmatpush.bf16.msra.mxu0 %v2632_v60  ;;  %1116 = vmatpush.bf16.msra.mxu1 %v2641_v63 }
 0x155   :  { %1130 = vmatpush.bf16.msra.mxu2 %v2653_v3  ;;  %1144 = vmatpush.bf16.msra.mxu3 %v2657_v4 }
 0x158   :  { %1103 = vmatpush.bf16.msra.mxu0 %v2674_v9  ;;  %1117 = vmatpush.bf16.msra.mxu1 %v2685_v13 }
 0x159   :  { %1131 = vmatpush.bf16.msra.mxu2 %v2696_v17  ;;  %1145 = vmatpush.bf16.msra.mxu3 %v2687_v14 }
 0x15c   :  { %1104 = vmatpush.bf16.msra.mxu0 %v2713_v22  ;;  %1118 = vmatpush.bf16.msra.mxu1 %v2724_v26 }
 0x15d   :  { %1132 = vmatpush.bf16.msra.mxu2 %v2735_v30  ;;  %1146 = vmatpush.bf16.msra.mxu3 %v2726_v27 }
 0x160   :  { %1105 = vmatpush.bf16.msra.mxu0 %v2752_v35  ;;  %1119 = vmatpush.bf16.msra.mxu1 %v2763_v40 }
 0x161   :  { %1133 = vmatpush.bf16.msra.mxu2 %v2774_v45  ;;  %1147 = vmatpush.bf16.msra.mxu3 %v2765_v42 }
 0x164   :  { %1106 = vmatpush.bf16.msra.mxu0 %v2791_v54  ;;  %1120 = vmatpush.bf16.msra.mxu1 %v2802_v61 }
 0x165   :  { %1134 = vmatpush.bf16.msra.mxu2 %v2813_v2  ;;  %1148 = vmatpush.bf16.msra.mxu3 %v2804_v62 }
 0x168   :  { %1107 = vmatpush.bf16.msra.mxu0 %v2830_v10  ;;  %1121 = vmatpush.bf16.msra.mxu1 %v2841_v16 }
 0x169   :  { %1135 = vmatpush.bf16.msra.mxu2 %v2852_v21  ;;  %1149 = vmatpush.bf16.msra.mxu3 %v2843_v18 }
 0x1c7   :  { %v879_v0 = vpop.f32.mrf.mxu0  ;;  %v893_v36 = vpop.f32.mrf.mxu1 }
 0x1c8   :  { %v926_v56 = vadd.f32 %v879_v0, %v308_v24  ;;  %v927_v57 = vadd.f32 %v893_v36, %v357_v11 }
 0x1ca   :  { %v934_v38 = vmul.f32 0.5, %v926_v56  ;;  %v935_v32 = vmul.f32 0.5, %v927_v57  ;;  %v3580_v56 = vld [vmem:[#allocation4_spill] sm:$0xff] }
 0x1cb   :  { %v408_v57 = vadd.f32 %v3580_v56, %v3068_v58 }
 0x1cc   :  { %2176 = vtanh.f32 %v934_v38  ;;  %v3581_v38 = vld [vmem:[#allocation5_spill] sm:$0xff] }
 0x1cd   :  { %2178 = vtanh.f32 %v935_v32  ;;  %v457_v32 = vadd.f32 %v3581_v38, %v3066_v1 }
 0x1ce   :  { %v907_v28 = vpop.f32.mrf.mxu2  ;;  %v921_v53 = vpop.f32.mrf.mxu3 }
 0x1cf   :  { %v928_v25 = vadd.f32 %v907_v28, %v406_v33  ;;  %v929_v15 = vadd.f32 %v921_v53, %v455_v34  ;;  %v881_v31 = vpop.f32.mrf.mxu0  ;;  %v895_v5 = vpop.f32.mrf.mxu1 }
 0x1d0   :  { %v930_v7 = vadd.f32 %v881_v31, %v310_v39  ;;  %v931_v23 = vadd.f32 %v895_v5, %v359_v43 }
 0x1d1   :  { %v936_v24 = vmul.f32 0.5, %v928_v25  ;;  %2180 = vtanh.f32 %v929_v15 }
 0x1d2   :  { %v2177_v44 = vpop.eup %2176  ;;  %v937_v11 = vmul.f32 0.5, %v930_v7  ;;  %v938_v46 = vmul.f32 0.5, %v931_v23 }
 0x1d3   :  { %v2179_v0 = vpop.eup %2178  ;;  %v946_v36 = vmul.f32 0.5, %v2177_v44  ;;  %2182 = vtanh.f32 %v936_v24 }
 0x1d4   :  { %v947_v50 = vmul.f32 0.5, %v2179_v0  ;;  %2184 = vtanh.f32 %v937_v11 }
 0x1d5   :  { %v952_v33 = vadd.f32 0.5, %v946_v36  ;;  %2186 = vtanh.f32 %v938_v46 }
 0x1d6   :  { %v953_v34 = vadd.f32 0.5, %v947_v50  ;;  %v909_v39 = vpop.f32.mrf.mxu2  ;;  %v923_v8 = vpop.f32.mrf.mxu3 }
 0x1d7   :  { %v2181_v43 = vpop.eup %2180  ;;  %v932_v28 = vadd.f32 %v909_v39, %v408_v57  ;;  %v933_v53 = vadd.f32 %v923_v8, %v457_v32 }
 0x1d8   :  { %v960_v25 = vmul.f32 %v953_v34, %v3082_v20  ;;  %v962_v15 = vmul.f32 %v2181_v43, %v952_v33  ;;  %v3149_v20 = vld [vmem:[%s3524_s1] sm:$0xff] }
 0x1d9   :  { %v2183_v31 = vpop.eup %2182  ;;  %v939_v5 = vmul.f32 0.5, %v932_v28  ;;  %2188 = vtanh.f32 %v933_v53  ;;  %vm855_vm0 = vcmp.gt.f32.partialorder %v3149_v20, 0.0  ;;  %vm970_vm1 = vcmp.gt.f32.partialorder %v3149_v20, 1.0 }
 0x1da   :  { %v2185_v7 = vpop.eup %2184  ;;  %v3143_v23 = vadd.f32 %v962_v15, %v960_v25  ;;  %v948_v46 = vmul.f32 0.5, %v2183_v31  ;;  %v857_v8 = vsel %vm855_vm0, %v3088_v12, 0.0  ;;  %vm1085_vm4 = vcmp.gt.f32.partialorder %v3149_v20, 2.0 }
 0x1db   :  { %v2187_v24 = vpop.eup %2186  ;;  %v949_v44 = vmul.f32 0.5, %v2185_v7  ;;  %2190 = vtanh.f32 %v939_v5  ;;  %vm1200_vm6 = vcmp.gt.f32.partialorder %v3149_v20, 3.0  ;;  %vm1315_vm8 = vcmp.gt.f32.partialorder %v3149_v20, 4.0 }
 0x1dc   :  { %2192 = vtanh.f32 %v3143_v23  ;;  %v950_v11 = vmul.f32 0.5, %v2187_v24  ;;  %v954_v32 = vadd.f32 0.5, %v948_v46  ;;  %vm1430_vm10 = vcmp.gt.f32.partialorder %v3149_v20, 5.0  ;;  %v3614_v20 = vld [vmem:[#allocation38_spill] sm:$0xff] }
 0x1dd   :  { %v955_v0 = vadd.f32 0.5, %v949_v44 }
 0x1de   :  { %v956_v36 = vadd.f32 0.5, %v950_v11  ;;  %v3583_v11 = vld [vmem:[#allocation7_spill] sm:$0xff] }
 0x1df   :  { %v2189_v50 = vpop.eup %2188  ;;  %v362_v46 = vadd.f32 %v3583_v11, %v3056_v6 }
 0x1e0   :  { %v961_v56 = vmul.f32 %v956_v36, %v3085_v51  ;;  %v963_v57 = vmul.f32 %v2189_v50, %v955_v0  ;;  %v3163_v51 = vld [vmem:[%s3524_s1 + $0x8] sm:$0xff] }
 0x1e1   :  { %v2191_v38 = vpop.eup %2190  ;;  %vm856_vm2 = vcmp.gt.f32.partialorder %v3163_v51, 0.0  ;;  %vm971_vm3 = vcmp.gt.f32.partialorder %v3163_v51, 1.0  ;;  %vm1086_vm5 = vcmp.gt.f32.partialorder %v3163_v51, 2.0  ;;  %vm1201_vm7 = vcmp.gt.f32.partialorder %v3163_v51, 3.0 }
 0x1e2   :  { %v2193_v33 = vpop.eup %2192  ;;  %v3153_v34 = vadd.f32 %v963_v57, %v961_v56  ;;  %v951_v43 = vmul.f32 0.5, %v2191_v38  ;;  %v858_v5 = vsel %vm856_vm2, %v3090_v19, 0.0  ;;  %v3582_v19 = vld [vmem:[#allocation6_spill] sm:$0xff]  ;;  %vm1316_vm9 = vcmp.gt.f32.partialorder %v3163_v51, 4.0 }
 0x1e3   :  { %v968_v39 = vmul.f32 %v2193_v33, %v954_v32  ;;  %v313_v44 = vadd.f32 %v3582_v19, %v3054_v29  ;;  %v3584_v32 = vld [vmem:[#allocation8_spill] sm:$0xff]  ;;  %vm1431_vm11 = vcmp.gt.f32.partialorder %v3163_v51, 5.0 }
 0x1e4   :  { %2194 = vtanh.f32 %v3153_v34  ;;  %v957_v25 = vadd.f32 0.5, %v951_v43  ;;  %v411_v33 = vadd.f32 %v3584_v32, %v3068_v58  ;;  %v3586_v43 = vld [vmem:[#allocation10_spill] sm:$0xff] }
 0x1e5   :  { %v972_v28 = vsel %vm970_vm1, %v968_v39, 0.0 }
 0x1e6   :  { %v3158_v53 = vadd.f32 %v972_v28, %v857_v8  ;;  %v315_v28 = vadd.f32 %v3586_v43, %v3054_v29 }
 0x1ea   :  { %v2195_v15 = vpop.eup %2194 }
 0x1eb   :  { %v969_v31 = vmul.f32 %v2195_v15, %v957_v25  ;;  %v3587_v25 = vld [vmem:[#allocation11_spill] sm:$0xff] }
 0x1ec   :  { %v364_v15 = vadd.f32 %v3587_v25, %v3056_v6 }
 0x1ed   :  { %v973_v7 = vsel %vm971_vm3, %v969_v31, 0.0  ;;  %v984_v12 = vpack.c.bf16 %v969_v31, %v968_v39  ;;  %v3585_v39 = vld [vmem:[#allocation9_spill] sm:$0xff] }
 0x1ee   :  { %v3168_v24 = vadd.f32 %v973_v7, %v858_v5  ;;  %v460_v8 = vadd.f32 %v3585_v39, %v3066_v1  ;;  %v3588_v39 = vld [vmem:[#allocation12_spill] sm:$0xff] }
 0x1ef   :  { %993 = vmatmul.bf16.vlgmr.msrb.gmra.mxu0 %v984_v12  ;;  %1007 = vmatmul.bf16.vlgmr.msrb.gmra.mxu1 %v984_v12  ;;  %v413_v43 = vadd.f32 %v3588_v39, %v3068_v58 }
 0x1f0   :  { %1021 = vmatmul.bf16.vlgmr.msrb.gmra.mxu2 %v984_v12  ;;  %1035 = vmatmul.bf16.vlgmr.msrb.gmra.mxu3 %v984_v12 }
 0x1f1   :  { %1215 = vmatpush.bf16.msrb.mxu0 %v2566_v37  ;;  %1229 = vmatpush.bf16.msrb.mxu1 %v2577_v41 }
 0x1f2   :  { %1243 = vmatpush.bf16.msrb.mxu2 %v2594_v47  ;;  %1257 = vmatpush.bf16.msrb.mxu3 %v2597_v48 }
 0x1f5   :  { %1216 = vmatpush.bf16.msrb.mxu0 %v2599_v49  ;;  %1230 = vmatpush.bf16.msrb.mxu1 %v2608_v52 }
 0x1f6   :  { %1244 = vmatpush.bf16.msrb.mxu2 %v2617_v55  ;;  %1258 = vmatpush.bf16.msrb.mxu3 %v2630_v59 }
 0x1f9   :  { %1217 = vmatpush.bf16.msrb.mxu0 %v2632_v60  ;;  %1231 = vmatpush.bf16.msrb.mxu1 %v2641_v63 }
 0x1fa   :  { %1245 = vmatpush.bf16.msrb.mxu2 %v2653_v3  ;;  %1259 = vmatpush.bf16.msrb.mxu3 %v2657_v4 }
 0x1fd   :  { %1218 = vmatpush.bf16.msrb.mxu0 %v2674_v9  ;;  %1232 = vmatpush.bf16.msrb.mxu1 %v2685_v13 }
 0x1fe   :  { %1246 = vmatpush.bf16.msrb.mxu2 %v2696_v17  ;;  %1260 = vmatpush.bf16.msrb.mxu3 %v2687_v14 }
 0x201   :  { %1219 = vmatpush.bf16.msrb.mxu0 %v2713_v22  ;;  %1233 = vmatpush.bf16.msrb.mxu1 %v2724_v26 }
 0x202   :  { %1247 = vmatpush.bf16.msrb.mxu2 %v2735_v30  ;;  %1261 = vmatpush.bf16.msrb.mxu3 %v2726_v27 }
 0x205   :  { %1220 = vmatpush.bf16.msrb.mxu0 %v2752_v35  ;;  %1234 = vmatpush.bf16.msrb.mxu1 %v2763_v40 }
 0x206   :  { %1248 = vmatpush.bf16.msrb.mxu2 %v2774_v45  ;;  %1262 = vmatpush.bf16.msrb.mxu3 %v2765_v42 }
 0x209   :  { %1221 = vmatpush.bf16.msrb.mxu0 %v2791_v54  ;;  %1235 = vmatpush.bf16.msrb.mxu1 %v2802_v61 }
 0x20a   :  { %1249 = vmatpush.bf16.msrb.mxu2 %v2813_v2  ;;  %1263 = vmatpush.bf16.msrb.mxu3 %v2804_v62 }
 0x20d   :  { %1222 = vmatpush.bf16.msrb.mxu0 %v2830_v10  ;;  %1236 = vmatpush.bf16.msrb.mxu1 %v2841_v16 }
 0x20e   :  { %1250 = vmatpush.bf16.msrb.mxu2 %v2852_v21  ;;  %1264 = vmatpush.bf16.msrb.mxu3 %v2843_v18 }
 0x26c   :  { %v994_v0 = vpop.f32.mrf.mxu0  ;;  %v1008_v36 = vpop.f32.mrf.mxu1 }
 0x26d   :  { %v1041_v50 = vadd.f32 %v994_v0, %v313_v44  ;;  %v1042_v56 = vadd.f32 %v1008_v36, %v362_v46 }
 0x26f   :  { %v1049_v57 = vmul.f32 0.5, %v1041_v50  ;;  %v1050_v38 = vmul.f32 0.5, %v1042_v56 }
 0x271   :  { %2196 = vtanh.f32 %v1049_v57 }
 0x272   :  { %2198 = vtanh.f32 %v1050_v38 }
 0x273   :  { %v1022_v31 = vpop.f32.mrf.mxu2  ;;  %v1036_v5 = vpop.f32.mrf.mxu3 }
 0x274   :  { %v1043_v7 = vadd.f32 %v1022_v31, %v411_v33  ;;  %v1044_v12 = vadd.f32 %v1036_v5, %v460_v8  ;;  %v996_v19 = vpop.f32.mrf.mxu0  ;;  %v1010_v44 = vpop.f32.mrf.mxu1  ;;  %v3589_v33 = vld [vmem:[#allocation13_spill] sm:$0xff] }
 0x275   :  { %v1045_v11 = vadd.f32 %v996_v19, %v315_v28  ;;  %v1046_v46 = vadd.f32 %v1010_v44, %v364_v15  ;;  %v462_v8 = vadd.f32 %v3589_v33, %v3066_v1 }
 0x276   :  { %v1051_v0 = vmul.f32 0.5, %v1043_v7  ;;  %2200 = vtanh.f32 %v1044_v12 }
 0x277   :  { %v2197_v36 = vpop.eup %2196  ;;  %v1052_v50 = vmul.f32 0.5, %v1045_v11  ;;  %v1053_v56 = vmul.f32 0.5, %v1046_v46 }
 0x278   :  { %v2199_v57 = vpop.eup %2198  ;;  %v1061_v38 = vmul.f32 0.5, %v2197_v36  ;;  %2202 = vtanh.f32 %v1051_v0 }
 0x279   :  { %v1062_v32 = vmul.f32 0.5, %v2199_v57  ;;  %2204 = vtanh.f32 %v1052_v50 }
 0x27a   :  { %v1067_v25 = vadd.f32 0.5, %v1061_v38  ;;  %2206 = vtanh.f32 %v1053_v56 }
 0x27b   :  { %v1068_v28 = vadd.f32 0.5, %v1062_v32  ;;  %v1024_v15 = vpop.f32.mrf.mxu2  ;;  %v1038_v31 = vpop.f32.mrf.mxu3 }
 0x27c   :  { %v2201_v5 = vpop.eup %2200  ;;  %v1047_v7 = vadd.f32 %v1024_v15, %v413_v43  ;;  %v1048_v12 = vadd.f32 %v1038_v31, %v462_v8 }
 0x27d   :  { %v1075_v19 = vmul.f32 %v1068_v28, %v3143_v23  ;;  %v1077_v44 = vmul.f32 %v2201_v5, %v1067_v25 }
 0x27e   :  { %v2203_v11 = vpop.eup %2202  ;;  %v1054_v46 = vmul.f32 0.5, %v1047_v7  ;;  %2208 = vtanh.f32 %v1048_v12 }
 0x27f   :  { %v2205_v0 = vpop.eup %2204  ;;  %v3219_v36 = vadd.f32 %v1077_v44, %v1075_v19  ;;  %v1063_v38 = vmul.f32 0.5, %v2203_v11 }
 0x280   :  { %v2207_v50 = vpop.eup %2206  ;;  %v1064_v57 = vmul.f32 0.5, %v2205_v0  ;;  %2210 = vtanh.f32 %v1054_v46 }
 0x281   :  { %2212 = vtanh.f32 %v3219_v36  ;;  %v1065_v56 = vmul.f32 0.5, %v2207_v50  ;;  %v1069_v25 = vadd.f32 0.5, %v1063_v38  ;;  %v3591_v50 = vld [vmem:[#allocation15_spill] sm:$0xff] }
 0x282   :  { %v1070_v32 = vadd.f32 0.5, %v1064_v57  ;;  %v367_v57 = vadd.f32 %v3591_v50, %v3056_v6 }
 0x283   :  { %v1071_v39 = vadd.f32 0.5, %v1065_v56 }
 0x284   :  { %v2209_v43 = vpop.eup %2208 }
 0x285   :  { %v1076_v33 = vmul.f32 %v1071_v39, %v3153_v34  ;;  %v1078_v23 = vmul.f32 %v2209_v43, %v1070_v32 }
 0x286   :  { %v2211_v8 = vpop.eup %2210 }
 0x287   :  { %v2213_v28 = vpop.eup %2212  ;;  %v3223_v15 = vadd.f32 %v1078_v23, %v1076_v33  ;;  %v1066_v5 = vmul.f32 0.5, %v2211_v8  ;;  %v3592_v23 = vld [vmem:[#allocation16_spill] sm:$0xff] }
 0x288   :  { %v1083_v31 = vmul.f32 %v2213_v28, %v1069_v25  ;;  %v416_v8 = vadd.f32 %v3592_v23, %v3068_v58  ;;  %v3593_v25 = vld [vmem:[#allocation17_spill] sm:$0xff] }
 0x289   :  { %2214 = vtanh.f32 %v3223_v15  ;;  %v1072_v19 = vadd.f32 0.5, %v1066_v5  ;;  %v465_v28 = vadd.f32 %v3593_v25, %v3066_v1  ;;  %v3596_v25 = vld [vmem:[#allocation20_spill] sm:$0xff] }
 0x28a   :  { %v1087_v7 = vsel %vm1085_vm4, %v1083_v31, 0.0 }
 0x28b   :  { %v3228_v12 = vadd.f32 %v1087_v7, %v3158_v53  ;;  %v3590_v53 = vld [vmem:[#allocation14_spill] sm:$0xff]  ;;  %v3595_v7 = vld [vmem:[#allocation19_spill] sm:$0xff] }
 0x28f   :  { %v2215_v44 = vpop.eup %2214 }
 0x290   :  { %v1084_v34 = vmul.f32 %v2215_v44, %v1072_v19  ;;  %v369_v19 = vadd.f32 %v3595_v7, %v3056_v6 }
 0x292   :  { %v1088_v11 = vsel %vm1086_vm5, %v1084_v34, 0.0  ;;  %v1099_v46 = vpack.c.bf16 %v1084_v34, %v1083_v31  ;;  %v3594_v31 = vld [vmem:[#allocation18_spill] sm:$0xff] }
 0x293   :  { %v3232_v0 = vadd.f32 %v1088_v11, %v3168_v24  ;;  %v318_v24 = vadd.f32 %v3590_v53, %v3054_v29  ;;  %v320_v5 = vadd.f32 %v3594_v31, %v3054_v29  ;;  %v418_v31 = vadd.f32 %v3596_v25, %v3068_v58 }
 0x294   :  { %1108 = vmatmul.bf16.vlgmr.msra.gmra.mxu0 %v1099_v46  ;;  %1122 = vmatmul.bf16.vlgmr.msra.gmra.mxu1 %v1099_v46 }
 0x295   :  { %1136 = vmatmul.bf16.vlgmr.msra.gmra.mxu2 %v1099_v46  ;;  %1150 = vmatmul.bf16.vlgmr.msra.gmra.mxu3 %v1099_v46 }
 0x296   :  { %1330 = vmatpush.bf16.msra.mxu0 %v2566_v37  ;;  %1344 = vmatpush.bf16.msra.mxu1 %v2577_v41 }
 0x297   :  { %1358 = vmatpush.bf16.msra.mxu2 %v2594_v47  ;;  %1372 = vmatpush.bf16.msra.mxu3 %v2597_v48 }
 0x29a   :  { %1331 = vmatpush.bf16.msra.mxu0 %v2599_v49  ;;  %1345 = vmatpush.bf16.msra.mxu1 %v2608_v52 }
 0x29b   :  { %1359 = vmatpush.bf16.msra.mxu2 %v2617_v55  ;;  %1373 = vmatpush.bf16.msra.mxu3 %v2630_v59 }
 0x29e   :  { %1332 = vmatpush.bf16.msra.mxu0 %v2632_v60  ;;  %1346 = vmatpush.bf16.msra.mxu1 %v2641_v63 }
 0x29f   :  { %1360 = vmatpush.bf16.msra.mxu2 %v2653_v3  ;;  %1374 = vmatpush.bf16.msra.mxu3 %v2657_v4 }
 0x2a2   :  { %1333 = vmatpush.bf16.msra.mxu0 %v2674_v9  ;;  %1347 = vmatpush.bf16.msra.mxu1 %v2685_v13 }
 0x2a3   :  { %1361 = vmatpush.bf16.msra.mxu2 %v2696_v17  ;;  %1375 = vmatpush.bf16.msra.mxu3 %v2687_v14 }
 0x2a6   :  { %1334 = vmatpush.bf16.msra.mxu0 %v2713_v22  ;;  %1348 = vmatpush.bf16.msra.mxu1 %v2724_v26 }
 0x2a7   :  { %1362 = vmatpush.bf16.msra.mxu2 %v2735_v30  ;;  %1376 = vmatpush.bf16.msra.mxu3 %v2726_v27 }
 0x2aa   :  { %1335 = vmatpush.bf16.msra.mxu0 %v2752_v35  ;;  %1349 = vmatpush.bf16.msra.mxu1 %v2763_v40 }
 0x2ab   :  { %1363 = vmatpush.bf16.msra.mxu2 %v2774_v45  ;;  %1377 = vmatpush.bf16.msra.mxu3 %v2765_v42 }
 0x2ae   :  { %1336 = vmatpush.bf16.msra.mxu0 %v2791_v54  ;;  %1350 = vmatpush.bf16.msra.mxu1 %v2802_v61 }
 0x2af   :  { %1364 = vmatpush.bf16.msra.mxu2 %v2813_v2  ;;  %1378 = vmatpush.bf16.msra.mxu3 %v2804_v62 }
 0x2b2   :  { %1337 = vmatpush.bf16.msra.mxu0 %v2830_v10  ;;  %1351 = vmatpush.bf16.msra.mxu1 %v2841_v16 }
 0x2b3   :  { %1365 = vmatpush.bf16.msra.mxu2 %v2852_v21  ;;  %1379 = vmatpush.bf16.msra.mxu3 %v2843_v18 }
 0x311   :  { %v1109_v56 = vpop.f32.mrf.mxu0  ;;  %v1123_v38 = vpop.f32.mrf.mxu1 }
 0x312   :  { %v1156_v32 = vadd.f32 %v1109_v56, %v318_v24  ;;  %v1157_v39 = vadd.f32 %v1123_v38, %v367_v57 }
 0x314   :  { %v1164_v43 = vmul.f32 0.5, %v1156_v32  ;;  %v1165_v33 = vmul.f32 0.5, %v1157_v39 }
 0x316   :  { %2216 = vtanh.f32 %v1164_v43 }
 0x317   :  { %2218 = vtanh.f32 %v1165_v33 }
 0x318   :  { %v1137_v44 = vpop.f32.mrf.mxu2  ;;  %v1151_v34 = vpop.f32.mrf.mxu3 }
 0x319   :  { %v1158_v11 = vadd.f32 %v1137_v44, %v416_v8  ;;  %v1159_v46 = vadd.f32 %v1151_v34, %v465_v28  ;;  %v1111_v53 = vpop.f32.mrf.mxu0  ;;  %v1125_v24 = vpop.f32.mrf.mxu1  ;;  %v3597_v8 = vld [vmem:[#allocation21_spill] sm:$0xff] }
 0x31a   :  { %v1160_v50 = vadd.f32 %v1111_v53, %v320_v5  ;;  %v1161_v57 = vadd.f32 %v1125_v24, %v369_v19  ;;  %v467_v28 = vadd.f32 %v3597_v8, %v3066_v1 }
 0x31b   :  { %v1166_v56 = vmul.f32 0.5, %v1158_v11  ;;  %2220 = vtanh.f32 %v1159_v46 }
 0x31c   :  { %v2217_v38 = vpop.eup %2216  ;;  %v1167_v32 = vmul.f32 0.5, %v1160_v50  ;;  %v1168_v39 = vmul.f32 0.5, %v1161_v57 }
 0x31d   :  { %v2219_v43 = vpop.eup %2218  ;;  %v1176_v33 = vmul.f32 0.5, %v2217_v38  ;;  %2222 = vtanh.f32 %v1166_v56 }
 0x31e   :  { %v1177_v23 = vmul.f32 0.5, %v2219_v43  ;;  %2224 = vtanh.f32 %v1167_v32 }
 0x31f   :  { %v1182_v7 = vadd.f32 0.5, %v1176_v33  ;;  %2226 = vtanh.f32 %v1168_v39 }
 0x320   :  { %v1183_v5 = vadd.f32 0.5, %v1177_v23  ;;  %v1139_v19 = vpop.f32.mrf.mxu2  ;;  %v1153_v44 = vpop.f32.mrf.mxu3 }
 0x321   :  { %v2221_v34 = vpop.eup %2220  ;;  %v1162_v11 = vadd.f32 %v1139_v19, %v418_v31  ;;  %v1163_v46 = vadd.f32 %v1153_v44, %v467_v28 }
 0x322   :  { %v1190_v53 = vmul.f32 %v1183_v5, %v3219_v36  ;;  %v1192_v24 = vmul.f32 %v2221_v34, %v1182_v7 }
 0x323   :  { %v2223_v50 = vpop.eup %2222  ;;  %v1169_v57 = vmul.f32 0.5, %v1162_v11  ;;  %2228 = vtanh.f32 %v1163_v46 }
 0x324   :  { %v2225_v56 = vpop.eup %2224  ;;  %v3283_v38 = vadd.f32 %v1192_v24, %v1190_v53  ;;  %v1178_v33 = vmul.f32 0.5, %v2223_v50 }
 0x325   :  { %v2227_v32 = vpop.eup %2226  ;;  %v1179_v43 = vmul.f32 0.5, %v2225_v56  ;;  %2230 = vtanh.f32 %v1169_v57 }
 0x326   :  { %2232 = vtanh.f32 %v3283_v38  ;;  %v1180_v39 = vmul.f32 0.5, %v2227_v32  ;;  %v1184_v7 = vadd.f32 0.5, %v1178_v33  ;;  %v3599_v32 = vld [vmem:[#allocation23_spill] sm:$0xff] }
 0x327   :  { %v1185_v23 = vadd.f32 0.5, %v1179_v43  ;;  %v372_v43 = vadd.f32 %v3599_v32, %v3056_v6 }
 0x328   :  { %v1186_v25 = vadd.f32 0.5, %v1180_v39 }
 0x329   :  { %v2229_v31 = vpop.eup %2228 }
 0x32a   :  { %v1191_v8 = vmul.f32 %v1186_v25, %v3223_v15  ;;  %v1193_v36 = vmul.f32 %v2229_v31, %v1185_v23 }
 0x32b   :  { %v2231_v28 = vpop.eup %2230 }
 0x32c   :  { %v2233_v5 = vpop.eup %2232  ;;  %v3287_v19 = vadd.f32 %v1193_v36, %v1191_v8  ;;  %v1181_v34 = vmul.f32 0.5, %v2231_v28  ;;  %v3600_v36 = vld [vmem:[#allocation24_spill] sm:$0xff] }
 0x32d   :  { %v1198_v44 = vmul.f32 %v2233_v5, %v1184_v7  ;;  %v421_v28 = vadd.f32 %v3600_v36, %v3068_v58  ;;  %v3601_v7 = vld [vmem:[#allocation25_spill] sm:$0xff] }
 0x32e   :  { %2234 = vtanh.f32 %v3287_v19  ;;  %v1187_v53 = vadd.f32 0.5, %v1181_v34  ;;  %v470_v5 = vadd.f32 %v3601_v7, %v3066_v1  ;;  %v3604_v7 = vld [vmem:[#allocation28_spill] sm:$0xff] }
 0x32f   :  { %v1202_v11 = vsel %vm1200_vm6, %v1198_v44, 0.0 }
 0x330   :  { %v3292_v46 = vadd.f32 %v1202_v11, %v3228_v12  ;;  %v3598_v12 = vld [vmem:[#allocation22_spill] sm:$0xff]  ;;  %v3603_v11 = vld [vmem:[#allocation27_spill] sm:$0xff] }
 0x334   :  { %v2235_v24 = vpop.eup %2234 }
 0x335   :  { %v1199_v15 = vmul.f32 %v2235_v24, %v1187_v53  ;;  %v374_v53 = vadd.f32 %v3603_v11, %v3056_v6 }
 0x337   :  { %v1203_v50 = vsel %vm1201_vm7, %v1199_v15, 0.0  ;;  %v1214_v57 = vpack.c.bf16 %v1199_v15, %v1198_v44  ;;  %v3602_v44 = vld [vmem:[#allocation26_spill] sm:$0xff] }
 0x338   :  { %v3296_v56 = vadd.f32 %v1203_v50, %v3232_v0  ;;  %v323_v0 = vadd.f32 %v3598_v12, %v3054_v29  ;;  %v325_v34 = vadd.f32 %v3602_v44, %v3054_v29  ;;  %v423_v44 = vadd.f32 %v3604_v7, %v3068_v58 }
 0x339   :  { %1223 = vmatmul.bf16.vlgmr.msrb.gmra.mxu0 %v1214_v57  ;;  %1237 = vmatmul.bf16.vlgmr.msrb.gmra.mxu1 %v1214_v57 }
 0x33a   :  { %1251 = vmatmul.bf16.vlgmr.msrb.gmra.mxu2 %v1214_v57  ;;  %1265 = vmatmul.bf16.vlgmr.msrb.gmra.mxu3 %v1214_v57 }
 0x33b   :  { %1445 = vmatpush.bf16.msrb.mxu0 %v2566_v37  ;;  %1459 = vmatpush.bf16.msrb.mxu1 %v2577_v41 }
 0x33c   :  { %1473 = vmatpush.bf16.msrb.mxu2 %v2594_v47  ;;  %1487 = vmatpush.bf16.msrb.mxu3 %v2597_v48 }
 0x33f   :  { %1446 = vmatpush.bf16.msrb.mxu0 %v2599_v49  ;;  %1460 = vmatpush.bf16.msrb.mxu1 %v2608_v52 }
 0x340   :  { %1474 = vmatpush.bf16.msrb.mxu2 %v2617_v55  ;;  %1488 = vmatpush.bf16.msrb.mxu3 %v2630_v59 }
 0x343   :  { %1447 = vmatpush.bf16.msrb.mxu0 %v2632_v60  ;;  %1461 = vmatpush.bf16.msrb.mxu1 %v2641_v63 }
 0x344   :  { %1475 = vmatpush.bf16.msrb.mxu2 %v2653_v3  ;;  %1489 = vmatpush.bf16.msrb.mxu3 %v2657_v4 }
 0x347   :  { %1448 = vmatpush.bf16.msrb.mxu0 %v2674_v9  ;;  %1462 = vmatpush.bf16.msrb.mxu1 %v2685_v13 }
 0x348   :  { %1476 = vmatpush.bf16.msrb.mxu2 %v2696_v17  ;;  %1490 = vmatpush.bf16.msrb.mxu3 %v2687_v14 }
 0x34b   :  { %1449 = vmatpush.bf16.msrb.mxu0 %v2713_v22  ;;  %1463 = vmatpush.bf16.msrb.mxu1 %v2724_v26 }
 0x34c   :  { %1477 = vmatpush.bf16.msrb.mxu2 %v2735_v30  ;;  %1491 = vmatpush.bf16.msrb.mxu3 %v2726_v27 }
 0x34f   :  { %1450 = vmatpush.bf16.msrb.mxu0 %v2752_v35  ;;  %1464 = vmatpush.bf16.msrb.mxu1 %v2763_v40 }
 0x350   :  { %1478 = vmatpush.bf16.msrb.mxu2 %v2774_v45  ;;  %1492 = vmatpush.bf16.msrb.mxu3 %v2765_v42 }
 0x353   :  { %1451 = vmatpush.bf16.msrb.mxu0 %v2791_v54  ;;  %1465 = vmatpush.bf16.msrb.mxu1 %v2802_v61 }
 0x354   :  { %1479 = vmatpush.bf16.msrb.mxu2 %v2813_v2  ;;  %1493 = vmatpush.bf16.msrb.mxu3 %v2804_v62 }
 0x357   :  { %1452 = vmatpush.bf16.msrb.mxu0 %v2830_v10  ;;  %1466 = vmatpush.bf16.msrb.mxu1 %v2841_v16 }
 0x358   :  { %1480 = vmatpush.bf16.msrb.mxu2 %v2852_v21  ;;  %1494 = vmatpush.bf16.msrb.mxu3 %v2843_v18 }
 0x3b6   :  { %v1224_v39 = vpop.f32.mrf.mxu0  ;;  %v1238_v33 = vpop.f32.mrf.mxu1 }
 0x3b7   :  { %v1271_v23 = vadd.f32 %v1224_v39, %v323_v0  ;;  %v1272_v25 = vadd.f32 %v1238_v33, %v372_v43 }
 0x3b9   :  { %v1279_v31 = vmul.f32 0.5, %v1271_v23  ;;  %v1280_v8 = vmul.f32 0.5, %v1272_v25 }
 0x3bb   :  { %2236 = vtanh.f32 %v1279_v31 }
 0x3bc   :  { %2238 = vtanh.f32 %v1280_v8 }
 0x3bd   :  { %v1252_v24 = vpop.f32.mrf.mxu2  ;;  %v1266_v15 = vpop.f32.mrf.mxu3 }
 0x3be   :  { %v1273_v50 = vadd.f32 %v1252_v24, %v421_v28  ;;  %v1274_v57 = vadd.f32 %v1266_v15, %v470_v5  ;;  %v1226_v12 = vpop.f32.mrf.mxu0  ;;  %v1240_v0 = vpop.f32.mrf.mxu1  ;;  %v3605_v28 = vld [vmem:[#allocation29_spill] sm:$0xff] }
 0x3bf   :  { %v1275_v32 = vadd.f32 %v1226_v12, %v325_v34  ;;  %v1276_v43 = vadd.f32 %v1240_v0, %v374_v53  ;;  %v472_v5 = vadd.f32 %v3605_v28, %v3066_v1 }
 0x3c0   :  { %v1281_v39 = vmul.f32 0.5, %v1273_v50  ;;  %2240 = vtanh.f32 %v1274_v57 }
 0x3c1   :  { %v2237_v33 = vpop.eup %2236  ;;  %v1282_v23 = vmul.f32 0.5, %v1275_v32  ;;  %v1283_v25 = vmul.f32 0.5, %v1276_v43 }
 0x3c2   :  { %v2239_v31 = vpop.eup %2238  ;;  %v1291_v8 = vmul.f32 0.5, %v2237_v33  ;;  %2242 = vtanh.f32 %v1281_v39 }
 0x3c3   :  { %v1292_v36 = vmul.f32 0.5, %v2239_v31  ;;  %2244 = vtanh.f32 %v1282_v23 }
 0x3c4   :  { %v1297_v11 = vadd.f32 0.5, %v1291_v8  ;;  %2246 = vtanh.f32 %v1283_v25 }
 0x3c5   :  { %v1298_v34 = vadd.f32 0.5, %v1292_v36  ;;  %v1254_v53 = vpop.f32.mrf.mxu2  ;;  %v1268_v24 = vpop.f32.mrf.mxu3 }
 0x3c6   :  { %v2241_v15 = vpop.eup %2240  ;;  %v1277_v50 = vadd.f32 %v1254_v53, %v423_v44  ;;  %v1278_v57 = vadd.f32 %v1268_v24, %v472_v5 }
 0x3c7   :  { %v1305_v12 = vmul.f32 %v1298_v34, %v3283_v38  ;;  %v1307_v0 = vmul.f32 %v2241_v15, %v1297_v11 }
 0x3c8   :  { %v2243_v32 = vpop.eup %2242  ;;  %v1284_v43 = vmul.f32 0.5, %v1277_v50  ;;  %2248 = vtanh.f32 %v1278_v57 }
 0x3c9   :  { %v2245_v39 = vpop.eup %2244  ;;  %v3347_v33 = vadd.f32 %v1307_v0, %v1305_v12  ;;  %v1293_v8 = vmul.f32 0.5, %v2243_v32 }
 0x3ca   :  { %v2247_v23 = vpop.eup %2246  ;;  %v1294_v31 = vmul.f32 0.5, %v2245_v39  ;;  %2250 = vtanh.f32 %v1284_v43 }
 0x3cb   :  { %2252 = vtanh.f32 %v3347_v33  ;;  %v1295_v25 = vmul.f32 0.5, %v2247_v23  ;;  %v1299_v11 = vadd.f32 0.5, %v1293_v8 }
 0x3cc   :  { %v1300_v36 = vadd.f32 0.5, %v1294_v31  ;;  %v3613_v31 = vld [vmem:[#allocation37_spill] sm:$0xff] }
 0x3cd   :  { %v1301_v7 = vadd.f32 0.5, %v1295_v25  ;;  %v477_v25 = vadd.f32 %v3613_v31, %v3066_v1 }
 0x3ce   :  { %v2249_v44 = vpop.eup %2248 }
 0x3cf   :  { %v1306_v28 = vmul.f32 %v1301_v7, %v3287_v19  ;;  %v1308_v38 = vmul.f32 %v2249_v44, %v1300_v36 }
 0x3d0   :  { %v2251_v5 = vpop.eup %2250 }
 0x3d1   :  { %v2253_v34 = vpop.eup %2252  ;;  %v3351_v53 = vadd.f32 %v1308_v38, %v1306_v28  ;;  %v1296_v15 = vmul.f32 0.5, %v2251_v5 }
 0x3d2   :  { %v1313_v24 = vmul.f32 %v2253_v34, %v1299_v11 }
 0x3d3   :  { %2254 = vtanh.f32 %v3351_v53  ;;  %v1302_v12 = vadd.f32 0.5, %v1296_v15 }
 0x3d4   :  { %v1317_v50 = vsel %vm1315_vm8, %v1313_v24, 0.0 }
 0x3d5   :  { %v3356_v57 = vadd.f32 %v1317_v50, %v3292_v46 }
 0x3d9   :  { %v2255_v0 = vpop.eup %2254 }
 0x3da   :  { %v1314_v19 = vmul.f32 %v2255_v0, %v1302_v12 }
 0x3dc   :  { %v1318_v32 = vsel %vm1316_vm9, %v1314_v19, 0.0  ;;  %v1329_v43 = vpack.c.bf16 %v1314_v19, %v1313_v24 }
 0x3dd   :  { %v3360_v39 = vadd.f32 %v1318_v32, %v3296_v56  ;;  %v3612_v56 = vld [vmem:[#allocation36_spill] sm:$0xff] }
 0x3de   :  { %1338 = vmatmul.bf16.vlgmr.msra.gmra.mxu0 %v1329_v43  ;;  %1352 = vmatmul.bf16.vlgmr.msra.gmra.mxu1 %v1329_v43  ;;  %v428_v23 = vadd.f32 %v3612_v56, %v3068_v58 }
 0x3df   :  { %1366 = vmatmul.bf16.vlgmr.msra.gmra.mxu2 %v1329_v43  ;;  %1380 = vmatmul.bf16.vlgmr.msra.gmra.mxu3 %v1329_v43 }
 0x3e0   :  { %1560 = vmatpush.bf16.msra.mxu0 %v2566_v37  ;;  %1574 = vmatpush.bf16.msra.mxu1 %v2577_v41  ;;  %v3606_v37 = vld [vmem:[#allocation30_spill] sm:$0xff] }
 0x3e1   :  { %1588 = vmatpush.bf16.msra.mxu2 %v2594_v47  ;;  %1602 = vmatpush.bf16.msra.mxu3 %v2597_v48  ;;  %v328_v41 = vadd.f32 %v3606_v37, %v3054_v29  ;;  %v3607_v47 = vld [vmem:[#allocation31_spill] sm:$0xff] }
 0x3e2   :  { %v377_v48 = vadd.f32 %v3607_v47, %v3056_v6 }
 0x3e4   :  { %1561 = vmatpush.bf16.msra.mxu0 %v2599_v49  ;;  %1575 = vmatpush.bf16.msra.mxu1 %v2608_v52 }
 0x3e5   :  { %1589 = vmatpush.bf16.msra.mxu2 %v2617_v55  ;;  %1603 = vmatpush.bf16.msra.mxu3 %v2630_v59 }
 0x3e8   :  { %1562 = vmatpush.bf16.msra.mxu0 %v2632_v60  ;;  %1576 = vmatpush.bf16.msra.mxu1 %v2641_v63 }
 0x3e9   :  { %1590 = vmatpush.bf16.msra.mxu2 %v2653_v3  ;;  %1604 = vmatpush.bf16.msra.mxu3 %v2657_v4  ;;  %v3608_v3 = vld [vmem:[#allocation32_spill] sm:$0xff] }
 0x3ea   :  { %v426_v4 = vadd.f32 %v3608_v3, %v3068_v58 }
 0x3ec   :  { %1563 = vmatpush.bf16.msra.mxu0 %v2674_v9  ;;  %1577 = vmatpush.bf16.msra.mxu1 %v2685_v13  ;;  %v3609_v9 = vld [vmem:[#allocation33_spill] sm:$0xff] }
 0x3ed   :  { %1591 = vmatpush.bf16.msra.mxu2 %v2696_v17  ;;  %1605 = vmatpush.bf16.msra.mxu3 %v2687_v14  ;;  %v475_v13 = vadd.f32 %v3609_v9, %v3066_v1  ;;  %v3610_v14 = vld [vmem:[#allocation34_spill] sm:$0xff] }
 0x3ee   :  { %v330_v17 = vadd.f32 %v3610_v14, %v3054_v29 }
 0x3f0   :  { %1564 = vmatpush.bf16.msra.mxu0 %v2713_v22  ;;  %1578 = vmatpush.bf16.msra.mxu1 %v2724_v26  ;;  %v3611_v22 = vld [vmem:[#allocation35_spill] sm:$0xff] }
 0x3f1   :  { %1592 = vmatpush.bf16.msra.mxu2 %v2735_v30  ;;  %1606 = vmatpush.bf16.msra.mxu3 %v2726_v27  ;;  %v379_v26 = vadd.f32 %v3611_v22, %v3056_v6 }
 0x3f4   :  { %1565 = vmatpush.bf16.msra.mxu0 %v2752_v35  ;;  %1579 = vmatpush.bf16.msra.mxu1 %v2763_v40 }
 0x3f5   :  { %1593 = vmatpush.bf16.msra.mxu2 %v2774_v45  ;;  %1607 = vmatpush.bf16.msra.mxu3 %v2765_v42 }
 0x3f8   :  { %1566 = vmatpush.bf16.msra.mxu0 %v2791_v54  ;;  %1580 = vmatpush.bf16.msra.mxu1 %v2802_v61 }
 0x3f9   :  { %1594 = vmatpush.bf16.msra.mxu2 %v2813_v2  ;;  %1608 = vmatpush.bf16.msra.mxu3 %v2804_v62 }
 0x3fc   :  { %1567 = vmatpush.bf16.msra.mxu0 %v2830_v10  ;;  %1581 = vmatpush.bf16.msra.mxu1 %v2841_v16 }
 0x3fd   :  { %1595 = vmatpush.bf16.msra.mxu2 %v2852_v21  ;;  %1609 = vmatpush.bf16.msra.mxu3 %v2843_v18 }
 0x45b   :  { %v1339_v49 = vpop.f32.mrf.mxu0  ;;  %v1353_v52 = vpop.f32.mrf.mxu1 }
 0x45c   :  { %v1386_v55 = vadd.f32 %v1339_v49, %v328_v41  ;;  %v1387_v59 = vadd.f32 %v1353_v52, %v377_v48 }
 0x45e   :  { %v1394_v60 = vmul.f32 0.5, %v1386_v55  ;;  %v1395_v63 = vmul.f32 0.5, %v1387_v59 }
 0x460   :  { %2256 = vtanh.f32 %v1394_v60 }
 0x461   :  { %2258 = vtanh.f32 %v1395_v63 }
 0x462   :  { %v1367_v27 = vpop.f32.mrf.mxu2  ;;  %v1381_v30 = vpop.f32.mrf.mxu3 }
 0x463   :  { %v1388_v35 = vadd.f32 %v1367_v27, %v426_v4  ;;  %v1389_v40 = vadd.f32 %v1381_v30, %v475_v13  ;;  %v1341_v42 = vpop.f32.mrf.mxu0  ;;  %v1355_v45 = vpop.f32.mrf.mxu1 }
 0x464   :  { %v1390_v54 = vadd.f32 %v1341_v42, %v330_v17  ;;  %v1391_v61 = vadd.f32 %v1355_v45, %v379_v26  ;;  %v333_v26 = vadd.f32 %v3614_v20, %v3054_v29 }
 0x465   :  { %v1396_v62 = vmul.f32 0.5, %v1388_v35  ;;  %2260 = vtanh.f32 %v1389_v40 }
 0x466   :  { %v2257_v2 = vpop.eup %2256  ;;  %v1397_v10 = vmul.f32 0.5, %v1390_v54  ;;  %v1398_v16 = vmul.f32 0.5, %v1391_v61  ;;  %v3617_v61 = vld [vmem:[#allocation41_spill] sm:$0xff] }
 0x467   :  { %v2259_v18 = vpop.eup %2258  ;;  %v1406_v21 = vmul.f32 0.5, %v2257_v2  ;;  %2262 = vtanh.f32 %v1396_v62  ;;  %v480_v62 = vadd.f32 %v3617_v61, %v3066_v1  ;;  %v3618_v2 = vld [vmem:[#allocation42_spill] sm:$0xff]  ;;  %v3462_v61 = vld [vmem:[%s3524_s1 + $0x8] sm:$0xff] }
 0x468   :  { %v1407_v46 = vmul.f32 0.5, %v2259_v18  ;;  %2264 = vtanh.f32 %v1397_v10  ;;  %v335_v10 = vadd.f32 %v3618_v2, %v3054_v29  ;;  %vm1546_vm13 = vcmp.gt.f32.partialorder %v3462_v61, 6.0 }
 0x469   :  { %v1412_v8 = vadd.f32 0.5, %v1406_v21  ;;  %2266 = vtanh.f32 %v1398_v16  ;;  %v3619_v16 = vld [vmem:[#allocation43_spill] sm:$0xff]  ;;  %vm1661_vm15 = vcmp.gt.f32.partialorder %v3462_v61, 7.0 }
 0x46a   :  { %v1413_v36 = vadd.f32 0.5, %v1407_v46  ;;  %v1369_v7 = vpop.f32.mrf.mxu2  ;;  %v1383_v44 = vpop.f32.mrf.mxu3  ;;  %v384_v18 = vadd.f32 %v3619_v16, %v3056_v6 }
 0x46b   :  { %v2261_v28 = vpop.eup %2260  ;;  %v1392_v38 = vadd.f32 %v1369_v7, %v428_v23  ;;  %v1393_v5 = vadd.f32 %v1383_v44, %v477_v25 }
 0x46c   :  { %v1420_v11 = vmul.f32 %v1413_v36, %v3347_v33  ;;  %v1422_v34 = vmul.f32 %v2261_v28, %v1412_v8 }
 0x46d   :  { %v2263_v24 = vpop.eup %2262  ;;  %v1399_v15 = vmul.f32 0.5, %v1392_v38  ;;  %2268 = vtanh.f32 %v1393_v5 }
 0x46e   :  { %v2265_v50 = vpop.eup %2264  ;;  %v3411_v12 = vadd.f32 %v1422_v34, %v1420_v11  ;;  %v1408_v43 = vmul.f32 0.5, %v2263_v24  ;;  %v3620_v24 = vld [vmem:[#allocation44_spill] sm:$0xff] }
 0x46f   :  { %v2267_v0 = vpop.eup %2266  ;;  %v1409_v19 = vmul.f32 0.5, %v2265_v50  ;;  %2270 = vtanh.f32 %v1399_v15  ;;  %v433_v15 = vadd.f32 %v3620_v24, %v3068_v58  ;;  %v3621_v50 = vld [vmem:[#allocation45_spill] sm:$0xff] }
 0x470   :  { %2272 = vtanh.f32 %v3411_v12  ;;  %v1410_v32 = vmul.f32 0.5, %v2267_v0  ;;  %v1414_v52 = vadd.f32 0.5, %v1408_v43  ;;  %v482_v0 = vadd.f32 %v3621_v50, %v3066_v1 }
 0x471   :  { %v1415_v37 = vadd.f32 0.5, %v1409_v19 }
 0x472   :  { %v1416_v41 = vadd.f32 0.5, %v1410_v32 }
 0x473   :  { %v2269_v47 = vpop.eup %2268 }
 0x474   :  { %v1421_v48 = vmul.f32 %v1416_v41, %v3351_v53  ;;  %v1423_v33 = vmul.f32 %v2269_v47, %v1415_v37 }
 0x475   :  { %v2271_v49 = vpop.eup %2270 }
 0x476   :  { %v2273_v55 = vpop.eup %2272  ;;  %v3415_v59 = vadd.f32 %v1423_v33, %v1421_v48  ;;  %v1411_v63 = vmul.f32 0.5, %v2271_v49 }
 0x477   :  { %v1428_v60 = vmul.f32 %v2273_v55, %v1414_v52 }
 0x478   :  { %2274 = vtanh.f32 %v3415_v59  ;;  %v1417_v9 = vadd.f32 0.5, %v1411_v63 }
 0x479   :  { %v1432_v3 = vsel %vm1430_vm10, %v1428_v60, 0.0 }
 0x47a   :  { %v3420_v4 = vadd.f32 %v1432_v3, %v3356_v57  ;;  %v3615_v57 = vld [vmem:[#allocation39_spill] sm:$0xff] }
 0x47b   :  { %v382_v27 = vadd.f32 %v3615_v57, %v3056_v6 }
 0x47e   :  { %v2275_v13 = vpop.eup %2274 }
 0x47f   :  { %v1429_v53 = vmul.f32 %v2275_v13, %v1417_v9 }
 0x481   :  { %v1433_v14 = vsel %vm1431_vm11, %v1429_v53, 0.0  ;;  %v1444_v17 = vpack.c.bf16 %v1429_v53, %v1428_v60 }
 0x482   :  { %v3424_v22 = vadd.f32 %v1433_v14, %v3360_v39  ;;  %v3616_v39 = vld [vmem:[#allocation40_spill] sm:$0xff] }
 0x483   :  { %1453 = vmatmul.bf16.vlgmr.msrb.gmra.mxu0 %v1444_v17  ;;  %1467 = vmatmul.bf16.vlgmr.msrb.gmra.mxu1 %v1444_v17  ;;  %v431_v54 = vadd.f32 %v3616_v39, %v3068_v58 }
 0x484   :  { %1481 = vmatmul.bf16.vlgmr.msrb.gmra.mxu2 %v1444_v17  ;;  %1495 = vmatmul.bf16.vlgmr.msrb.gmra.mxu3 %v1444_v17 }
 0x500   :  { %v1454_v30 = vpop.f32.mrf.mxu0  ;;  %v1468_v35 = vpop.f32.mrf.mxu1 }
 0x501   :  { %v1501_v40 = vadd.f32 %v1454_v30, %v333_v26  ;;  %v1502_v51 = vadd.f32 %v1468_v35, %v382_v27 }
 0x503   :  { %v1509_v42 = vmul.f32 0.5, %v1501_v40  ;;  %v1510_v45 = vmul.f32 0.5, %v1502_v51  ;;  %v3452_v40 = vld [vmem:[%s3524_s1] sm:$0xff] }
 0x504   :  { %vm1545_vm12 = vcmp.gt.f32.partialorder %v3452_v40, 6.0  ;;  %vm1660_vm14 = vcmp.gt.f32.partialorder %v3452_v40, 7.0  ;;  %v2155_v40 = vld [vmem:[%s3525_s6] ss:$0 sm:$0xff] }
 0x505   :  { %2276 = vtanh.f32 %v1509_v42 }
 0x506   :  { %2278 = vtanh.f32 %v1510_v45 }
 0x507   :  { %v1482_v21 = vpop.f32.mrf.mxu2  ;;  %v1496_v46 = vpop.f32.mrf.mxu3 }
 0x508   :  { %v1503_v56 = vadd.f32 %v1482_v21, %v431_v54  ;;  %v1504_v23 = vadd.f32 %v1496_v46, %v480_v62  ;;  %v1456_v31 = vpop.f32.mrf.mxu0  ;;  %v1470_v25 = vpop.f32.mrf.mxu1  ;;  %v2151_v21 = vld [vmem:[%s3526_s5 + $0x28] sm:$0xff]  ;;  %v2149_v46 = vld [vmem:[%s3526_s5 + $0x18] sm:$0xff] }
 0x509   :  { %v1505_v8 = vadd.f32 %v1456_v31, %v335_v10  ;;  %v1506_v36 = vadd.f32 %v1470_v25, %v384_v18  ;;  %v2152_v18 = vld [vmem:[%s3526_s5 + $0x30] sm:$0xff]  ;;  %v3623_v25 = vld [vmem:[#allocation47_spill] sm:$0xff] }
 0x50a   :  { %v1511_v7 = vmul.f32 0.5, %v1503_v56  ;;  %2280 = vtanh.f32 %v1504_v23  ;;  %v2148_v56 = vld [vmem:[%s3526_s5 + $0x10] sm:$0xff]  ;;  %v3622_v23 = vld [vmem:[#allocation46_spill] sm:$0xff] }
 0x50b   :  { %v2277_v44 = vpop.eup %2276  ;;  %v1512_v28 = vmul.f32 0.5, %v1505_v8  ;;  %v1513_v38 = vmul.f32 0.5, %v1506_v36  ;;  %v338_v31 = vadd.f32 %v3622_v23, %v3054_v29  ;;  %v387_v8 = vadd.f32 %v3623_v25, %v3056_v6 }
 0x50c   :  { %v2279_v5 = vpop.eup %2278  ;;  %v1521_v11 = vmul.f32 0.5, %v2277_v44  ;;  %2282 = vtanh.f32 %v1511_v7 }
 0x50d   :  { %v1522_v34 = vmul.f32 0.5, %v2279_v5  ;;  %2284 = vtanh.f32 %v1512_v28 }
 0x50e   :  { %v1527_v19 = vadd.f32 0.5, %v1521_v11  ;;  %2286 = vtanh.f32 %v1513_v38  ;;  %v2147_v38 = vld [vmem:[%s3526_s5 + $0x8] sm:$0xff] }
 0x50f   :  { %v1528_v32 = vadd.f32 0.5, %v1522_v34  ;;  %v1484_v43 = vpop.f32.mrf.mxu2  ;;  %v1498_v37 = vpop.f32.mrf.mxu3  ;;  %v3624_v34 = vld [vmem:[#allocation48_spill] sm:$0xff] }
 0x510   :  { %v2281_v41 = vpop.eup %2280  ;;  %v1507_v47 = vadd.f32 %v1484_v43, %v433_v15  ;;  %v1508_v48 = vadd.f32 %v1498_v37, %v482_v0  ;;  %v436_v24 = vadd.f32 %v3624_v34, %v3068_v58  ;;  %v3625_v15 = vld [vmem:[#allocation49_spill] sm:$0xff]  ;;  %v2146_v0 = vld [vmem:[%s3526_s5] sm:$0xff] }
 0x511   :  { %v1535_v33 = vmul.f32 %v1528_v32, %v3411_v12  ;;  %v1537_v49 = vmul.f32 %v2281_v41, %v1527_v19  ;;  %v485_v50 = vadd.f32 %v3625_v15, %v3066_v1  ;;  %v3626_v19 = vld [vmem:[#allocation50_spill] sm:$0xff]  ;;  %v3627_v43 = vld [vmem:[#allocation51_spill] sm:$0xff] }
 0x512   :  { %v2283_v52 = vpop.eup %2282  ;;  %v1514_v55 = vmul.f32 0.5, %v1507_v47  ;;  %2288 = vtanh.f32 %v1508_v48  ;;  %v340_v32 = vadd.f32 %v3626_v19, %v3054_v29  ;;  %v389_v37 = vadd.f32 %v3627_v43, %v3056_v6  ;;  %v3628_v6 = vld [vmem:[#allocation52_spill] sm:$0xff] }
 0x513   :  { %v2285_v60 = vpop.eup %2284  ;;  %v3443_v63 = vadd.f32 %v1537_v49, %v1535_v33  ;;  %v1523_v53 = vmul.f32 0.5, %v2283_v52 }
 0x514   :  { %v2287_v3 = vpop.eup %2286  ;;  %v1524_v9 = vmul.f32 0.5, %v2285_v60  ;;  %2290 = vtanh.f32 %v1514_v55 }
 0x515   :  { %2292 = vtanh.f32 %v3443_v63  ;;  %v1525_v13 = vmul.f32 0.5, %v2287_v3  ;;  %v1529_v27 = vadd.f32 0.5, %v1523_v53 }
 0x516   :  { %v1530_v14 = vadd.f32 0.5, %v1524_v9 }
 0x517   :  { %v1531_v17 = vadd.f32 0.5, %v1525_v13 }
 0x518   :  { %v2289_v20 = vpop.eup %2288 }
 0x519   :  { %v1536_v26 = vmul.f32 %v1531_v17, %v3415_v59  ;;  %v1538_v12 = vmul.f32 %v2289_v20, %v1530_v14  ;;  %v438_v20 = vadd.f32 %v3628_v6, %v3068_v58 }
 0x51a   :  { %v2291_v57 = vpop.eup %2290 }
 0x51b   :  { %v2293_v30 = vpop.eup %2292  ;;  %v3447_v35 = vadd.f32 %v1538_v12, %v1536_v26  ;;  %v1526_v42 = vmul.f32 0.5, %v2291_v57  ;;  %v3629_v26 = vld [vmem:[#allocation53_spill] sm:$0xff] }
 0x51c   :  { %v1543_v51 = vmul.f32 %v2293_v30, %v1529_v27  ;;  %v487_v12 = vadd.f32 %v3629_v26, %v3066_v1 }
 0x51d   :  { %2294 = vtanh.f32 %v3447_v35  ;;  %v1532_v39 = vadd.f32 0.5, %v1526_v42 }
 0x51e   :  { %v1547_v45 = vsel %vm1545_vm12, %v1543_v51, 0.0 }
 0x51f   :  { %v3457_v59 = vadd.f32 %v1547_v45, %v3420_v4  ;;  %v2153_v4 = vld [vmem:[%s3526_s5 + $0x38] sm:$0xff] }
 0x520   :  { %1736 = vmatpush.bf16.msrb.mxu0 %v2153_v4 }
 0x523   :  { %v2295_v54 = vpop.eup %2294 }
 0x524   :  { %v1544_v62 = vmul.f32 %v2295_v54, %v1532_v39  ;;  %1737 = vmatpush.bf16.msrb.mxu0 %v2152_v18 }
 0x526   :  { %v1548_v2 = vsel %vm1546_vm13, %v1544_v62, 0.0  ;;  %v1559_v10 = vpack.c.bf16 %v1544_v62, %v1543_v51 }
 0x527   :  { %v3466_v16 = vadd.f32 %v1548_v2, %v3424_v22  ;;  %v2150_v22 = vld [vmem:[%s3526_s5 + $0x20] sm:$0xff] }
 0x528   :  { %1568 = vmatmul.bf16.vlgmr.msra.gmra.mxu0 %v1559_v10  ;;  %1582 = vmatmul.bf16.vlgmr.msra.gmra.mxu1 %v1559_v10 }
 0x529   :  { %1596 = vmatmul.bf16.vlgmr.msra.gmra.mxu2 %v1559_v10  ;;  %1610 = vmatmul.bf16.vlgmr.msra.gmra.mxu3 %v1559_v10 }
 0x52a   :  { %1738 = vmatpush.bf16.msrb.mxu0 %v2151_v21 }
 0x52e   :  { %1739 = vmatpush.bf16.msrb.mxu0 %v2150_v22 }
 0x532   :  { %1740 = vmatpush.bf16.msrb.mxu0 %v2149_v46 }
 0x536   :  { %1741 = vmatpush.bf16.msrb.mxu0 %v2148_v56 }
 0x53a   :  { %1742 = vmatpush.bf16.msrb.mxu0 %v2147_v38 }
 0x53e   :  { %1743 = vmatpush.bf16.msrb.mxu0 %v2146_v0 }
 0x5a5   :  { %v1569_v36 = vpop.f32.mrf.mxu0  ;;  %v1583_v7 = vpop.f32.mrf.mxu1 }
 0x5a6   :  { %v1616_v44 = vadd.f32 %v1569_v36, %v338_v31  ;;  %v1617_v28 = vadd.f32 %v1583_v7, %v387_v8 }
 0x5a8   :  { %v1624_v5 = vmul.f32 0.5, %v1616_v44  ;;  %v1625_v11 = vmul.f32 0.5, %v1617_v28 }
 0x5aa   :  { %2296 = vtanh.f32 %v1624_v5 }
 0x5ab   :  { %2298 = vtanh.f32 %v1625_v11 }
 0x5ac   :  { %v1597_v41 = vpop.f32.mrf.mxu2  ;;  %v1611_v47 = vpop.f32.mrf.mxu3 }
 0x5ad   :  { %v1618_v48 = vadd.f32 %v1597_v41, %v436_v24  ;;  %v1619_v33 = vadd.f32 %v1611_v47, %v485_v50  ;;  %v1571_v49 = vpop.f32.mrf.mxu0  ;;  %v1585_v52 = vpop.f32.mrf.mxu1 }
 0x5ae   :  { %v1620_v55 = vadd.f32 %v1571_v49, %v340_v32  ;;  %v1621_v60 = vadd.f32 %v1585_v52, %v389_v37 }
 0x5af   :  { %v1626_v3 = vmul.f32 0.5, %v1618_v48  ;;  %2300 = vtanh.f32 %v1619_v33 }
 0x5b0   :  { %v2297_v9 = vpop.eup %2296  ;;  %v1627_v13 = vmul.f32 0.5, %v1620_v55  ;;  %v1628_v53 = vmul.f32 0.5, %v1621_v60 }
 0x5b1   :  { %v2299_v14 = vpop.eup %2298  ;;  %v1636_v17 = vmul.f32 0.5, %v2297_v9  ;;  %2302 = vtanh.f32 %v1626_v3 }
 0x5b2   :  { %v1637_v29 = vmul.f32 0.5, %v2299_v14  ;;  %2304 = vtanh.f32 %v1627_v13 }
 0x5b3   :  { %v1642_v57 = vadd.f32 0.5, %v1636_v17  ;;  %2306 = vtanh.f32 %v1628_v53 }
 0x5b4   :  { %v1643_v27 = vadd.f32 0.5, %v1637_v29  ;;  %v1599_v30 = vpop.f32.mrf.mxu2  ;;  %v1613_v51 = vpop.f32.mrf.mxu3 }
 0x5b5   :  { %v2301_v42 = vpop.eup %2300  ;;  %v1622_v45 = vadd.f32 %v1599_v30, %v438_v20  ;;  %v1623_v39 = vadd.f32 %v1613_v51, %v487_v12 }
 0x5b6   :  { %v1650_v54 = vmul.f32 %v1643_v27, %v3443_v63  ;;  %v1652_v62 = vmul.f32 %v2301_v42, %v1642_v57 }
 0x5b7   :  { %v2303_v2 = vpop.eup %2302  ;;  %v1629_v10 = vmul.f32 0.5, %v1622_v45  ;;  %2308 = vtanh.f32 %v1623_v39 }
 0x5b8   :  { %v2305_v4 = vpop.eup %2304  ;;  %v1654_v18 = vadd.f32 %v1652_v62, %v1650_v54  ;;  %v1638_v22 = vmul.f32 0.5, %v2303_v2 }
 0x5b9   :  { %v2307_v58 = vpop.eup %2306  ;;  %v1639_v21 = vmul.f32 0.5, %v2305_v4  ;;  %2310 = vtanh.f32 %v1629_v10 }
 0x5ba   :  { %2312 = vtanh.f32 %v1654_v18  ;;  %v1640_v1 = vmul.f32 0.5, %v2307_v58  ;;  %v1644_v63 = vadd.f32 0.5, %v1638_v22 }
 0x5bb   :  { %v1645_v46 = vadd.f32 0.5, %v1639_v21 }
 0x5bc   :  { %v1646_v56 = vadd.f32 0.5, %v1640_v1 }
 0x5bd   :  { %v2309_v23 = vpop.eup %2308 }
 0x5be   :  { %v1651_v31 = vmul.f32 %v1646_v56, %v3447_v35  ;;  %v1653_v25 = vmul.f32 %v2309_v23, %v1645_v46 }
 0x5bf   :  { %v2311_v8 = vpop.eup %2310 }
 0x5c0   :  { %v2313_v36 = vpop.eup %2312  ;;  %v1655_v7 = vadd.f32 %v1653_v25, %v1651_v31  ;;  %v1641_v28 = vmul.f32 0.5, %v2311_v8 }
 0x5c1   :  { %v1658_v44 = vmul.f32 %v2313_v36, %v1644_v63 }
 0x5c2   :  { %2314 = vtanh.f32 %v1655_v7  ;;  %v1647_v11 = vadd.f32 0.5, %v1641_v28 }
 0x5c3   :  { %v1662_v38 = vsel %vm1660_vm14, %v1658_v44, 0.0 }
 0x5c4   :  { %v1664_v5 = vadd.f32 %v1662_v38, %v3457_v59 }
 0x5c8   :  { %v2315_v34 = vpop.eup %2314 }
 0x5c9   :  { %v1659_v24 = vmul.f32 %v2315_v34, %v1647_v11 }
 0x5cb   :  { %v1663_v15 = vsel %vm1661_vm15, %v1659_v24, 0.0 }
 0x5cc   :  { %v1665_v35 = vadd.f32 %v1663_v15, %v3466_v16 }
 0x5ce   :  { %v1666_v50 = vadd.f32 %v1665_v35, %v1664_v5 }
 0x5d0   :  { %v1667_v0 = vpack.c.bf16 %v1666_v50, %v1666_v50 }
 0x5d2   :  { %1744 = vmatmul.bf16.vlgmr.msrb.gmra.mxu0 %v1667_v0 }
 0x64f   :  { %v1745_v19 = vpop.f32.mrf.mxu0 }
 0x650   :  { %v1746_v32 = vadd.f32 %v2155_v40, %v1745_v19 }
 0x652   :  { %1749 = vst [vmem:[%s3527_s7] sm:$0xff] %v1746_v32 }
 0x657   :  { %v1747_v59 = vpop.f32.mrf.mxu0 }

</bundles_post_ra>
